<compile_context>
chip_gen: v7x
topology: tpu7x:2x2x1
jax: 0.10.0
libtpu: 0.0.40
codegen_flags: <defaults>
</compile_context>

<pallas_src>
import functools

import jax
import jax.numpy as jnp
import numpy as np
from jax.experimental import pallas as pl
from jax.experimental.pallas import tpu as pltpu


# ------------------------------------------------------------------ kernel ---
def _bilstm_kernel(g_ref, len_ref, whh_ref, out_ref, hN_ref, h_sc, c_sc,
                   *, tt, hh):
    """Fused bidirectional LSTM recurrence.

    grid = (2 directions [parallel], num_time_chunks [arbitrary])

    g_ref   : (1, TT, B, 4*Hh) pre-computed gates x@W_ih^T + b for this chunk
              (forward: chunk c; backward: chunk nc-1-c via index_map)
    len_ref : (B, 1) int32 valid lengths
    whh_ref : (1, Hh, 4*Hh)  W_hh^T for this direction
    out_ref : (1, TT, B, Hh) per-step hidden outputs (zeroed past each length)
    hN_ref  : (1, B, Hh)     final hidden state for this direction
    h_sc/c_sc : VMEM scratch carried across time chunks.
    """
    d = pl.program_id(0)           # direction: 0 = forward, 1 = backward
    c = pl.program_id(1)           # time-chunk counter
    nc = pl.num_programs(1)

    @pl.when(c == 0)
    def _():
        h_sc[...] = jnp.zeros_like(h_sc)
        c_sc[...] = jnp.zeros_like(c_sc)

    whh = whh_ref[0]               # (Hh, 4*Hh), resident (block index const in c)
    len_col = len_ref[...]         # (B, 1) int32

    # Original-time chunk index this grid step works on (matches the index_map).
    chunk_idx = d * (nc - 1 - c) + (1 - d) * c
    chunk_base = chunk_idx * tt

    def step(s, carry):
        h, cst = carry
        # Within-chunk original-time offset: forward walks 0..TT-1,
        # backward walks TT-1..0.
        j = d * (tt - 1 - 2 * s) + s
        gates = g_ref[0, j] + jnp.dot(h, whh,
                                      preferred_element_type=jnp.float32)
        i_g = jax.nn.sigmoid(gates[:, 0 * hh:1 * hh])
        f_g = jax.nn.sigmoid(gates[:, 1 * hh:2 * hh])
        g_g = jnp.tanh(gates[:, 2 * hh:3 * hh])
        o_g = jax.nn.sigmoid(gates[:, 3 * hh:4 * hh])
        c_new = f_g * cst + i_g * g_g
        h_new = o_g * jnp.tanh(c_new)

        m = len_col > (chunk_base + j)                       # (B, 1) bool
        h = jnp.where(m, h_new, h)                           # freeze after len
        cst = jnp.where(m, c_new, cst)
        out_ref[0, j] = jnp.where(m, h_new, 0.0).astype(out_ref.dtype)
        return h, cst

    h, cst = jax.lax.fori_loop(0, tt, step, (h_sc[...], c_sc[...]), unroll=True)
    h_sc[...] = h
    c_sc[...] = cst
    hN_ref[0] = h.astype(hN_ref.dtype)   # final writeback value = last chunk's h


# -------------------------------------------------------------- module glue ---
def init_bilstm_params(key, embedding_size, hidden_dim):
    Hh = hidden_dim // 2
    bound = float(1.0 / np.sqrt(Hh))
    keys = jax.random.split(key, 8)

    def u(kk, shape):
        return jax.random.uniform(kk, shape, jnp.float32, -bound, bound)

    return {
        "wih_f": u(keys[0], (4 * Hh, embedding_size)),
        "whh_f": u(keys[1], (4 * Hh, Hh)),
        "bih_f": u(keys[2], (4 * Hh,)),
        "bhh_f": u(keys[3], (4 * Hh,)),
        "wih_b": u(keys[4], (4 * Hh, embedding_size)),
        "whh_b": u(keys[5], (4 * Hh, Hh)),
        "bih_b": u(keys[6], (4 * Hh,)),
        "bhh_b": u(keys[7], (4 * Hh,)),
    }


def bilstm_forward(params, x, input_mask, tt=8):
    """Matches torch BiLSTM.forward (single layer, bidirectional).

    x          : (B, T, E) float32
    input_mask : (B, T)    {0,1}
    returns    : padded_outputs (B, T, hidden_dim), hidden (2, B, hidden_dim//2)

    Note: jit-safe -- returns the full T-length output (zero past each length).
    torch's pad_packed_sequence truncates to max(length); the caller may slice.
    # TODO(synk): rnn_layers > 1 (stacked LSTM) not implemented; module default is 1.
    """
    B, T, E = x.shape
    Hh = params["whh_f"].shape[1]
    lengths = input_mask.sum(-1).astype(jnp.int32)

    B_pad = int(np.ceil(B / 8) * 8)          # f32 sublane alignment
    T_pad = int(np.ceil(T / tt) * tt)
    x_p = jnp.pad(x, ((0, B_pad - B), (0, T_pad - T), (0, 0)))
    len_p = jnp.pad(lengths, (0, B_pad - B))[:, None]        # (B_pad, 1), pads len=0

    # Stacked per-direction weights.
    w_ih = jnp.stack([params["wih_f"].T, params["wih_b"].T], axis=0)   # (2, E, 4Hh)
    w_hh = jnp.stack([params["whh_f"].T, params["whh_b"].T], axis=0)   # (2, Hh, 4Hh)
    bias = jnp.stack([params["bih_f"] + params["bhh_f"],
                      params["bih_b"] + params["bhh_b"]], axis=0)      # (2, 4Hh)

    # Hoisted input projection for all timesteps & both directions, produced
    # directly in (dir, time, batch, gate) layout -> one big parallel matmul.
    G = jnp.einsum("bte,deg->dtbg", x_p, w_ih,
                   preferred_element_type=jnp.float32) + bias[:, None, None, :]
    # G: (2, T_pad, B_pad, 4*Hh)

    nc = T_pad // tt
    kernel = functools.partial(_bilstm_kernel, tt=tt, hh=Hh)

    out_tm, hN = pl.pallas_call(
        kernel,
        out_shape=(jax.ShapeDtypeStruct((2, T_pad, B_pad, Hh), jnp.float32),
                   jax.ShapeDtypeStruct((2, B_pad, Hh), jnp.float32)),
        grid_spec=pltpu.PrefetchScalarGridSpec(
            num_scalar_prefetch=0,
            grid=(2, nc),
            in_specs=[
                # pre-gates: forward reads chunk c, backward reads chunk nc-1-c
                pl.BlockSpec((1, tt, B_pad, 4 * Hh),
                             lambda d, c: (d, d * (nc - 1 - c) + (1 - d) * c, 0, 0)),
                pl.BlockSpec((B_pad, 1), lambda d, c: (0, 0)),         # lengths
                pl.BlockSpec((1, Hh, 4 * Hh), lambda d, c: (d, 0, 0)),  # W_hh^T
            ],
            out_specs=(
                # per-step outputs land at their natural time positions
                pl.BlockSpec((1, tt, B_pad, Hh),
                             lambda d, c: (d, d * (nc - 1 - c) + (1 - d) * c, 0, 0)),
                pl.BlockSpec((1, B_pad, Hh), lambda d, c: (d, 0, 0)),   # final hidden
            ),
            scratch_shapes=[pltpu.VMEM((B_pad, Hh), jnp.float32),
                            pltpu.VMEM((B_pad, Hh), jnp.float32)],
        ),
        compiler_params=pltpu.CompilerParams(
            dimension_semantics=("parallel", "arbitrary"),
            vmem_limit_bytes=32 * 1024 * 1024),
    )(G, len_p, w_hh)

    out_f = out_tm[0, :T, :B]                # (T, B, Hh)
    out_b = out_tm[1, :T, :B]
    padded_outputs = jnp.transpose(jnp.concatenate([out_f, out_b], axis=-1),
                                   (1, 0, 2))                 # (B, T, 2*Hh)
    hidden = hN[:, :B]                                        # (2, B, Hh)
    return padded_outputs, hidden


# ------------------------------------------------------------ pure-JAX ref ---
def _ref_dir(x, lengths, wih, whh, bih, bhh):
    B, T, E = x.shape
    Hh = wih.shape[0] // 4

    def step(carry, inp):
        h, c = carry
        x_t, t = inp
        gates = x_t @ wih.T + bih + h @ whh.T + bhh
        i = jax.nn.sigmoid(gates[:, :Hh])
        f = jax.nn.sigmoid(gates[:, Hh:2 * Hh])
        g = jnp.tanh(gates[:, 2 * Hh:3 * Hh])
        o = jax.nn.sigmoid(gates[:, 3 * Hh:])
        c_new = f * c + i * g
        h_new = o * jnp.tanh(c_new)
        m = (lengths > t)[:, None]
        return ((jnp.where(m, h_new, h), jnp.where(m, c_new, c)),
                jnp.where(m, h_new, 0.0))

    init = (jnp.zeros((B, Hh), jnp.float32), jnp.zeros((B, Hh), jnp.float32))
    (hN, _), outs = jax.lax.scan(step, init,
                                 (jnp.transpose(x, (1, 0, 2)), jnp.arange(T)))
    return jnp.transpose(outs, (1, 0, 2)), hN


def ref_bilstm(params, x, mask):
    B, T, E = x.shape
    lengths = mask.sum(-1).astype(jnp.int32)
    out_f, h_f = _ref_dir(x, lengths, params["wih_f"], params["whh_f"],
                          params["bih_f"], params["bhh_f"])
    t_idx = jnp.arange(T)[None, :]
    rev_idx = jnp.clip(lengths[:, None] - 1 - t_idx, 0, T - 1)
    x_rev = jnp.take_along_axis(x, rev_idx[:, :, None], axis=1)
    out_b_rev, h_b = _ref_dir(x_rev, lengths, params["wih_b"], params["whh_b"],
                              params["bih_b"], params["bhh_b"])
    out_b = jnp.take_along_axis(out_b_rev, rev_idx[:, :, None], axis=1)
    out_b = out_b * (t_idx < lengths[:, None])[:, :, None].astype(out_b.dtype)
    return jnp.concatenate([out_f, out_b], -1), jnp.stack([h_f, h_b], 0)


# --------------------------------------------------------------------- main ---
if __name__ == "__main__":
    B, T, E, HID = 2, 8, 16, 32      # small shapes; module defaults are E=768, HID=512
    Hh = HID // 2

    key = jax.random.PRNGKey(0)
    kx, kp = jax.random.split(key)
    x = jax.random.normal(kx, (B, T, E), jnp.float32)
    # variable-length sequences via a 0/1 mask (lengths 8 and 5)
    input_mask = jnp.array([[1] * 8, [1] * 5 + [0] * 3], jnp.float32)

    params = init_bilstm_params(kp, E, HID)

    fwd = jax.jit(bilstm_forward)            # jit-safe (no traced-value int())
    out, hidden = fwd(params, x, input_mask)
    jax.block_until_ready((out, hidden))

    assert out.shape == (B, T, HID), out.shape
    assert hidden.shape == (2, B, Hh), hidden.shape

    ref_out, ref_hidden = ref_bilstm(params, x, input_mask)
    np.testing.assert_allclose(np.asarray(out), np.asarray(ref_out),
                               atol=5e-3, rtol=5e-3)
    np.testing.assert_allclose(np.asarray(hidden), np.asarray(ref_hidden),
                               atol=5e-3, rtol=5e-3)

    print("KERNEL_OK")
</pallas_src>

<mosaic_0001>
module attributes {stable_mosaic.version = 11 : i64} {
  func.func @_bilstm_kernel(%arg0: i32, %arg1: i32, %arg2: memref<1x8x8x64xf32, #tpu.memory_space<vmem>>, %arg3: memref<8x1xi32, #tpu.memory_space<vmem>>, %arg4: memref<1x16x64xf32, #tpu.memory_space<vmem>>, %arg5: memref<1x8x8x16xf32, #tpu.memory_space<vmem>>, %arg6: memref<1x8x16xf32, #tpu.memory_space<vmem>>, %arg7: memref<8x16xf32, #tpu.memory_space<vmem>>, %arg8: memref<8x16xf32, #tpu.memory_space<vmem>>) attributes {dimension_semantics = [#tpu.dimension_semantics<parallel>, #tpu.dimension_semantics<arbitrary>], iteration_bounds = array<i64: 2, 1>, scalar_prefetch = 0 : i64, scratch_operands = 2 : i64, tpu.core_type = #tpu.core_type<tc>, window_params = [{transform_indices = @transform_0, window_bounds = array<i64: 1, 8, 8, 64>}, {pipeline_mode = #tpu.pipeline_mode<synchronous>, transform_indices = @transform_1, window_bounds = array<i64: 8, 1>}, {transform_indices = @transform_2, window_bounds = array<i64: 1, 16, 64>}, {transform_indices = @transform_3, window_bounds = array<i64: 1, 8, 8, 16>}, {transform_indices = @transform_4, window_bounds = array<i64: 1, 8, 16>}]} {
    %c0_i32 = arith.constant 0 : i32
    %0 = arith.cmpi eq, %arg1, %c0_i32 : i32
    %1 = arith.extui %0 : i1 to i32
    %c0_i32_0 = arith.constant 0 : i32
    %2 = arith.cmpi ne, %1, %c0_i32_0 : i32
    scf.if %2 {
      %cst_123 = arith.constant 0.000000e+00 : f32
      %427 = vector.broadcast %cst_123 : f32 to vector<8x16xf32>
      %c0_124 = arith.constant 0 : index
      %c0_125 = arith.constant 0 : index
      %428 = vector.load %arg7[%c0_124, %c0_125] : memref<8x16xf32, #tpu.memory_space<vmem>>, vector<8x16xf32>
      tpu.vector_store %arg7[%c0_124, %c0_125], %427 {strides = array<i32>} : memref<8x16xf32, #tpu.memory_space<vmem>>, vector<8x16xf32>,
      %cst_126 = arith.constant 0.000000e+00 : f32
      %429 = vector.broadcast %cst_126 : f32 to vector<8x16xf32>
      %c0_127 = arith.constant 0 : index
      %c0_128 = arith.constant 0 : index
      %430 = vector.load %arg8[%c0_127, %c0_128] : memref<8x16xf32, #tpu.memory_space<vmem>>, vector<8x16xf32>
      tpu.vector_store %arg8[%c0_127, %c0_128], %429 {strides = array<i32>} : memref<8x16xf32, #tpu.memory_space<vmem>>, vector<8x16xf32>,
    } else {
    }
    %c0 = arith.constant 0 : index
    %c0_1 = arith.constant 0 : index
    %c0_2 = arith.constant 0 : index
    %3 = vector.load %arg4[%c0, %c0_1, %c0_2] : memref<1x16x64xf32, #tpu.memory_space<vmem>>, vector<1x16x64xf32>
    %4 = vector.shape_cast %3 : vector<1x16x64xf32> to vector<16x64xf32>
    %c0_3 = arith.constant 0 : index
    %c0_4 = arith.constant 0 : index
    %5 = vector.load %arg3[%c0_3, %c0_4] : memref<8x1xi32, #tpu.memory_space<vmem>>, vector<8x1xi32>
    %c0_i32_5 = arith.constant 0 : i32
    %6 = arith.subi %c0_i32_5, %arg1 : i32
    %7 = arith.muli %arg0, %6 : i32
    %c1_i32 = arith.constant 1 : i32
    %8 = arith.subi %c1_i32, %arg0 : i32
    %9 = arith.muli %8, %arg1 : i32
    %10 = arith.addi %7, %9 : i32
    %c8_i32 = arith.constant 8 : i32
    %11 = arith.muli %10, %c8_i32 : i32
    %c0_6 = arith.constant 0 : index
    %c0_7 = arith.constant 0 : index
    %12 = vector.load %arg7[%c0_6, %c0_7] : memref<8x16xf32, #tpu.memory_space<vmem>>, vector<8x16xf32>
    %c0_8 = arith.constant 0 : index
    %c0_9 = arith.constant 0 : index
    %13 = vector.load %arg8[%c0_8, %c0_9] : memref<8x16xf32, #tpu.memory_space<vmem>>, vector<8x16xf32>
    %c0_i32_10 = arith.constant 0 : i32
    %c2_i32 = arith.constant 2 : i32
    %14 = arith.muli %c2_i32, %c0_i32_10 : i32
    %c7_i32 = arith.constant 7 : i32
    %15 = arith.subi %c7_i32, %14 : i32
    %16 = arith.muli %arg0, %15 : i32
    %17 = arith.addi %16, %c0_i32_10 : i32
    %c0_11 = arith.constant 0 : index
    %18 = arith.index_cast %17 : i32 to index
    %c0_12 = arith.constant 0 : index
    %c0_13 = arith.constant 0 : index
    %19 = vector.load %arg2[%c0_11, %18, %c0_12, %c0_13] : memref<1x8x8x64xf32, #tpu.memory_space<vmem>>, vector<1x1x8x64xf32>
    %20 = vector.shape_cast %19 : vector<1x1x8x64xf32> to vector<8x64xf32>
    %cst = arith.constant dense<0.000000e+00> : vector<8x64xf32>
    %21 = tpu.matmul %12, %4, %cst {dimension_numbers = #tpu.dot_dimension_numbers<[1], [0], [0], [1], [0, 0, 1, 1], [], []>} : vector<8x16xf32>, vector<16x64xf32>, vector<8x64xf32> -> vector<8x64xf32>
    %22 = arith.addf %20, %21 : vector<8x64xf32>
    %23 = vector.extract_strided_slice %22 {offsets = [0, 0], sizes = [8, 16], strides = [1, 1]} : vector<8x64xf32> to vector<8x16xf32>
    %24 = arith.negf %23 : vector<8x16xf32>
    %25 = math.exp %24 : vector<8x16xf32>
    %cst_14 = arith.constant 1.000000e+00 : f32
    %26 = vector.broadcast %cst_14 : f32 to vector<8x16xf32>
    %27 = arith.addf %26, %25 : vector<8x16xf32>
    %28 = arith.divf %26, %27 : vector<8x16xf32>
    %29 = vector.extract_strided_slice %22 {offsets = [0, 16], sizes = [8, 16], strides = [1, 1]} : vector<8x64xf32> to vector<8x16xf32>
    %30 = arith.negf %29 : vector<8x16xf32>
    %31 = math.exp %30 : vector<8x16xf32>
    %cst_15 = arith.constant 1.000000e+00 : f32
    %32 = vector.broadcast %cst_15 : f32 to vector<8x16xf32>
    %33 = arith.addf %32, %31 : vector<8x16xf32>
    %34 = arith.divf %32, %33 : vector<8x16xf32>
    %35 = vector.extract_strided_slice %22 {offsets = [0, 32], sizes = [8, 16], strides = [1, 1]} : vector<8x64xf32> to vector<8x16xf32>
    %36 = math.tanh %35 : vector<8x16xf32>
    %37 = vector.extract_strided_slice %22 {offsets = [0, 48], sizes = [8, 16], strides = [1, 1]} : vector<8x64xf32> to vector<8x16xf32>
    %38 = arith.negf %37 : vector<8x16xf32>
    %39 = math.exp %38 : vector<8x16xf32>
    %cst_16 = arith.constant 1.000000e+00 : f32
    %40 = vector.broadcast %cst_16 : f32 to vector<8x16xf32>
    %41 = arith.addf %40, %39 : vector<8x16xf32>
    %42 = arith.divf %40, %41 : vector<8x16xf32>
    %43 = arith.mulf %34, %13 : vector<8x16xf32>
    %44 = arith.mulf %28, %36 : vector<8x16xf32>
    %45 = arith.addf %43, %44 : vector<8x16xf32>
    %46 = math.tanh %45 : vector<8x16xf32>
    %47 = arith.mulf %42, %46 : vector<8x16xf32>
    %48 = arith.addi %11, %17 : i32
    %49 = vector.broadcast %48 : i32 to vector<8x1xi32>
    %50 = arith.cmpi sgt, %5, %49 : vector<8x1xi32>
    %51 = vector.shape_cast %50 : vector<8x1xi1> to vector<8x1xi1>
    %52 = vector.broadcast %51 : vector<8x1xi1> to vector<8x16xi1>
    %53 = arith.select %52, %47, %12 : vector<8x16xi1>, vector<8x16xf32>
    %54 = vector.shape_cast %50 : vector<8x1xi1> to vector<8x1xi1>
    %55 = vector.broadcast %54 : vector<8x1xi1> to vector<8x16xi1>
    %56 = arith.select %55, %45, %13 : vector<8x16xi1>, vector<8x16xf32>
    %cst_17 = arith.constant 0.000000e+00 : f32
    %57 = vector.shape_cast %50 : vector<8x1xi1> to vector<8x1xi1>
    %58 = vector.broadcast %57 : vector<8x1xi1> to vector<8x16xi1>
    %59 = vector.broadcast %cst_17 : f32 to vector<8x16xf32>
    %60 = arith.select %58, %47, %59 : vector<8x16xi1>, vector<8x16xf32>
    %c0_18 = arith.constant 0 : index
    %61 = arith.index_cast %17 : i32 to index
    %c0_19 = arith.constant 0 : index
    %c0_20 = arith.constant 0 : index
    %62 = vector.load %arg5[%c0_18, %61, %c0_19, %c0_20] : memref<1x8x8x16xf32, #tpu.memory_space<vmem>>, vector<1x1x8x16xf32>
    %63 = vector.shape_cast %62 : vector<1x1x8x16xf32> to vector<8x16xf32>
    %64 = vector.shape_cast %60 : vector<8x16xf32> to vector<1x1x8x16xf32>
    tpu.vector_store %arg5[%c0_18, %61, %c0_19, %c0_20], %64 {strides = array<i32>} : memref<1x8x8x16xf32, #tpu.memory_space<vmem>>, vector<1x1x8x16xf32>,
    %c1_i32_21 = arith.constant 1 : i32
    %c2_i32_22 = arith.constant 2 : i32
    %65 = arith.muli %c2_i32_22, %c1_i32_21 : i32
    %c7_i32_23 = arith.constant 7 : i32
    %66 = arith.subi %c7_i32_23, %65 : i32
    %67 = arith.muli %arg0, %66 : i32
    %68 = arith.addi %67, %c1_i32_21 : i32
    %c0_24 = arith.constant 0 : index
    %69 = arith.index_cast %68 : i32 to index
    %c0_25 = arith.constant 0 : index
    %c0_26 = arith.constant 0 : index
    %70 = vector.load %arg2[%c0_24, %69, %c0_25, %c0_26] : memref<1x8x8x64xf32, #tpu.memory_space<vmem>>, vector<1x1x8x64xf32>
    %71 = vector.shape_cast %70 : vector<1x1x8x64xf32> to vector<8x64xf32>
    %cst_27 = arith.constant dense<0.000000e+00> : vector<8x64xf32>
    %72 = tpu.matmul %53, %4, %cst_27 {dimension_numbers = #tpu.dot_dimension_numbers<[1], [0], [0], [1], [0, 0, 1, 1], [], []>} : vector<8x16xf32>, vector<16x64xf32>, vector<8x64xf32> -> vector<8x64xf32>
    %73 = arith.addf %71, %72 : vector<8x64xf32>
    %74 = vector.extract_strided_slice %73 {offsets = [0, 0], sizes = [8, 16], strides = [1, 1]} : vector<8x64xf32> to vector<8x16xf32>
    %75 = arith.negf %74 : vector<8x16xf32>
    %76 = math.exp %75 : vector<8x16xf32>
    %cst_28 = arith.constant 1.000000e+00 : f32
    %77 = vector.broadcast %cst_28 : f32 to vector<8x16xf32>
    %78 = arith.addf %77, %76 : vector<8x16xf32>
    %79 = arith.divf %77, %78 : vector<8x16xf32>
    %80 = vector.extract_strided_slice %73 {offsets = [0, 16], sizes = [8, 16], strides = [1, 1]} : vector<8x64xf32> to vector<8x16xf32>
    %81 = arith.negf %80 : vector<8x16xf32>
    %82 = math.exp %81 : vector<8x16xf32>
    %cst_29 = arith.constant 1.000000e+00 : f32
    %83 = vector.broadcast %cst_29 : f32 to vector<8x16xf32>
    %84 = arith.addf %83, %82 : vector<8x16xf32>
    %85 = arith.divf %83, %84 : vector<8x16xf32>
    %86 = vector.extract_strided_slice %73 {offsets = [0, 32], sizes = [8, 16], strides = [1, 1]} : vector<8x64xf32> to vector<8x16xf32>
    %87 = math.tanh %86 : vector<8x16xf32>
    %88 = vector.extract_strided_slice %73 {offsets = [0, 48], sizes = [8, 16], strides = [1, 1]} : vector<8x64xf32> to vector<8x16xf32>
    %89 = arith.negf %88 : vector<8x16xf32>
    %90 = math.exp %89 : vector<8x16xf32>
    %cst_30 = arith.constant 1.000000e+00 : f32
    %91 = vector.broadcast %cst_30 : f32 to vector<8x16xf32>
    %92 = arith.addf %91, %90 : vector<8x16xf32>
    %93 = arith.divf %91, %92 : vector<8x16xf32>
    %94 = arith.mulf %85, %56 : vector<8x16xf32>
    %95 = arith.mulf %79, %87 : vector<8x16xf32>
    %96 = arith.addf %94, %95 : vector<8x16xf32>
    %97 = math.tanh %96 : vector<8x16xf32>
    %98 = arith.mulf %93, %97 : vector<8x16xf32>
    %99 = arith.addi %11, %68 : i32
    %100 = vector.broadcast %99 : i32 to vector<8x1xi32>
    %101 = arith.cmpi sgt, %5, %100 : vector<8x1xi32>
    %102 = vector.shape_cast %101 : vector<8x1xi1> to vector<8x1xi1>
    %103 = vector.broadcast %102 : vector<8x1xi1> to vector<8x16xi1>
    %104 = arith.select %103, %98, %53 : vector<8x16xi1>, vector<8x16xf32>
    %105 = vector.shape_cast %101 : vector<8x1xi1> to vector<8x1xi1>
    %106 = vector.broadcast %105 : vector<8x1xi1> to vector<8x16xi1>
    %107 = arith.select %106, %96, %56 : vector<8x16xi1>, vector<8x16xf32>
    %cst_31 = arith.constant 0.000000e+00 : f32
    %108 = vector.shape_cast %101 : vector<8x1xi1> to vector<8x1xi1>
    %109 = vector.broadcast %108 : vector<8x1xi1> to vector<8x16xi1>
    %110 = vector.broadcast %cst_31 : f32 to vector<8x16xf32>
    %111 = arith.select %109, %98, %110 : vector<8x16xi1>, vector<8x16xf32>
    %c0_32 = arith.constant 0 : index
    %112 = arith.index_cast %68 : i32 to index
    %c0_33 = arith.constant 0 : index
    %c0_34 = arith.constant 0 : index
    %113 = vector.load %arg5[%c0_32, %112, %c0_33, %c0_34] : memref<1x8x8x16xf32, #tpu.memory_space<vmem>>, vector<1x1x8x16xf32>
    %114 = vector.shape_cast %113 : vector<1x1x8x16xf32> to vector<8x16xf32>
    %115 = vector.shape_cast %111 : vector<8x16xf32> to vector<1x1x8x16xf32>
    tpu.vector_store %arg5[%c0_32, %112, %c0_33, %c0_34], %115 {strides = array<i32>} : memref<1x8x8x16xf32, #tpu.memory_space<vmem>>, vector<1x1x8x16xf32>,
    %c2_i32_35 = arith.constant 2 : i32
    %c2_i32_36 = arith.constant 2 : i32
    %116 = arith.muli %c2_i32_36, %c2_i32_35 : i32
    %c7_i32_37 = arith.constant 7 : i32
    %117 = arith.subi %c7_i32_37, %116 : i32
    %118 = arith.muli %arg0, %117 : i32
    %119 = arith.addi %118, %c2_i32_35 : i32
    %c0_38 = arith.constant 0 : index
    %120 = arith.index_cast %119 : i32 to index
    %c0_39 = arith.constant 0 : index
    %c0_40 = arith.constant 0 : index
    %121 = vector.load %arg2[%c0_38, %120, %c0_39, %c0_40] : memref<1x8x8x64xf32, #tpu.memory_space<vmem>>, vector<1x1x8x64xf32>
    %122 = vector.shape_cast %121 : vector<1x1x8x64xf32> to vector<8x64xf32>
    %cst_41 = arith.constant dense<0.000000e+00> : vector<8x64xf32>
    %123 = tpu.matmul %104, %4, %cst_41 {dimension_numbers = #tpu.dot_dimension_numbers<[1], [0], [0], [1], [0, 0, 1, 1], [], []>} : vector<8x16xf32>, vector<16x64xf32>, vector<8x64xf32> -> vector<8x64xf32>
    %124 = arith.addf %122, %123 : vector<8x64xf32>
    %125 = vector.extract_strided_slice %124 {offsets = [0, 0], sizes = [8, 16], strides = [1, 1]} : vector<8x64xf32> to vector<8x16xf32>
    %126 = arith.negf %125 : vector<8x16xf32>
    %127 = math.exp %126 : vector<8x16xf32>
    %cst_42 = arith.constant 1.000000e+00 : f32
    %128 = vector.broadcast %cst_42 : f32 to vector<8x16xf32>
    %129 = arith.addf %128, %127 : vector<8x16xf32>
    %130 = arith.divf %128, %129 : vector<8x16xf32>
    %131 = vector.extract_strided_slice %124 {offsets = [0, 16], sizes = [8, 16], strides = [1, 1]} : vector<8x64xf32> to vector<8x16xf32>
    %132 = arith.negf %131 : vector<8x16xf32>
    %133 = math.exp %132 : vector<8x16xf32>
    %cst_43 = arith.constant 1.000000e+00 : f32
    %134 = vector.broadcast %cst_43 : f32 to vector<8x16xf32>
    %135 = arith.addf %134, %133 : vector<8x16xf32>
    %136 = arith.divf %134, %135 : vector<8x16xf32>
    %137 = vector.extract_strided_slice %124 {offsets = [0, 32], sizes = [8, 16], strides = [1, 1]} : vector<8x64xf32> to vector<8x16xf32>
    %138 = math.tanh %137 : vector<8x16xf32>
    %139 = vector.extract_strided_slice %124 {offsets = [0, 48], sizes = [8, 16], strides = [1, 1]} : vector<8x64xf32> to vector<8x16xf32>
    %140 = arith.negf %139 : vector<8x16xf32>
    %141 = math.exp %140 : vector<8x16xf32>
    %cst_44 = arith.constant 1.000000e+00 : f32
    %142 = vector.broadcast %cst_44 : f32 to vector<8x16xf32>
    %143 = arith.addf %142, %141 : vector<8x16xf32>
    %144 = arith.divf %142, %143 : vector<8x16xf32>
    %145 = arith.mulf %136, %107 : vector<8x16xf32>
    %146 = arith.mulf %130, %138 : vector<8x16xf32>
    %147 = arith.addf %145, %146 : vector<8x16xf32>
    %148 = math.tanh %147 : vector<8x16xf32>
    %149 = arith.mulf %144, %148 : vector<8x16xf32>
    %150 = arith.addi %11, %119 : i32
    %151 = vector.broadcast %150 : i32 to vector<8x1xi32>
    %152 = arith.cmpi sgt, %5, %151 : vector<8x1xi32>
    %153 = vector.shape_cast %152 : vector<8x1xi1> to vector<8x1xi1>
    %154 = vector.broadcast %153 : vector<8x1xi1> to vector<8x16xi1>
    %155 = arith.select %154, %149, %104 : vector<8x16xi1>, vector<8x16xf32>
    %156 = vector.shape_cast %152 : vector<8x1xi1> to vector<8x1xi1>
    %157 = vector.broadcast %156 : vector<8x1xi1> to vector<8x16xi1>
    %158 = arith.select %157, %147, %107 : vector<8x16xi1>, vector<8x16xf32>
    %cst_45 = arith.constant 0.000000e+00 : f32
    %159 = vector.shape_cast %152 : vector<8x1xi1> to vector<8x1xi1>
    %160 = vector.broadcast %159 : vector<8x1xi1> to vector<8x16xi1>
    %161 = vector.broadcast %cst_45 : f32 to vector<8x16xf32>
    %162 = arith.select %160, %149, %161 : vector<8x16xi1>, vector<8x16xf32>
    %c0_46 = arith.constant 0 : index
    %163 = arith.index_cast %119 : i32 to index
    %c0_47 = arith.constant 0 : index
    %c0_48 = arith.constant 0 : index
    %164 = vector.load %arg5[%c0_46, %163, %c0_47, %c0_48] : memref<1x8x8x16xf32, #tpu.memory_space<vmem>>, vector<1x1x8x16xf32>
    %165 = vector.shape_cast %164 : vector<1x1x8x16xf32> to vector<8x16xf32>
    %166 = vector.shape_cast %162 : vector<8x16xf32> to vector<1x1x8x16xf32>
    tpu.vector_store %arg5[%c0_46, %163, %c0_47, %c0_48], %166 {strides = array<i32>} : memref<1x8x8x16xf32, #tpu.memory_space<vmem>>, vector<1x1x8x16xf32>,
    %c3_i32 = arith.constant 3 : i32
    %c2_i32_49 = arith.constant 2 : i32
    %167 = arith.muli %c2_i32_49, %c3_i32 : i32
    %c7_i32_50 = arith.constant 7 : i32
    %168 = arith.subi %c7_i32_50, %167 : i32
    %169 = arith.muli %arg0, %168 : i32
    %170 = arith.addi %169, %c3_i32 : i32
    %c0_51 = arith.constant 0 : index
    %171 = arith.index_cast %170 : i32 to index
    %c0_52 = arith.constant 0 : index
    %c0_53 = arith.constant 0 : index
    %172 = vector.load %arg2[%c0_51, %171, %c0_52, %c0_53] : memref<1x8x8x64xf32, #tpu.memory_space<vmem>>, vector<1x1x8x64xf32>
    %173 = vector.shape_cast %172 : vector<1x1x8x64xf32> to vector<8x64xf32>
    %cst_54 = arith.constant dense<0.000000e+00> : vector<8x64xf32>
    %174 = tpu.matmul %155, %4, %cst_54 {dimension_numbers = #tpu.dot_dimension_numbers<[1], [0], [0], [1], [0, 0, 1, 1], [], []>} : vector<8x16xf32>, vector<16x64xf32>, vector<8x64xf32> -> vector<8x64xf32>
    %175 = arith.addf %173, %174 : vector<8x64xf32>
    %176 = vector.extract_strided_slice %175 {offsets = [0, 0], sizes = [8, 16], strides = [1, 1]} : vector<8x64xf32> to vector<8x16xf32>
    %177 = arith.negf %176 : vector<8x16xf32>
    %178 = math.exp %177 : vector<8x16xf32>
    %cst_55 = arith.constant 1.000000e+00 : f32
    %179 = vector.broadcast %cst_55 : f32 to vector<8x16xf32>
    %180 = arith.addf %179, %178 : vector<8x16xf32>
    %181 = arith.divf %179, %180 : vector<8x16xf32>
    %182 = vector.extract_strided_slice %175 {offsets = [0, 16], sizes = [8, 16], strides = [1, 1]} : vector<8x64xf32> to vector<8x16xf32>
    %183 = arith.negf %182 : vector<8x16xf32>
    %184 = math.exp %183 : vector<8x16xf32>
    %cst_56 = arith.constant 1.000000e+00 : f32
    %185 = vector.broadcast %cst_56 : f32 to vector<8x16xf32>
    %186 = arith.addf %185, %184 : vector<8x16xf32>
    %187 = arith.divf %185, %186 : vector<8x16xf32>
    %188 = vector.extract_strided_slice %175 {offsets = [0, 32], sizes = [8, 16], strides = [1, 1]} : vector<8x64xf32> to vector<8x16xf32>
    %189 = math.tanh %188 : vector<8x16xf32>
    %190 = vector.extract_strided_slice %175 {offsets = [0, 48], sizes = [8, 16], strides = [1, 1]} : vector<8x64xf32> to vector<8x16xf32>
    %191 = arith.negf %190 : vector<8x16xf32>
    %192 = math.exp %191 : vector<8x16xf32>
    %cst_57 = arith.constant 1.000000e+00 : f32
    %193 = vector.broadcast %cst_57 : f32 to vector<8x16xf32>
    %194 = arith.addf %193, %192 : vector<8x16xf32>
    %195 = arith.divf %193, %194 : vector<8x16xf32>
    %196 = arith.mulf %187, %158 : vector<8x16xf32>
    %197 = arith.mulf %181, %189 : vector<8x16xf32>
    %198 = arith.addf %196, %197 : vector<8x16xf32>
    %199 = math.tanh %198 : vector<8x16xf32>
    %200 = arith.mulf %195, %199 : vector<8x16xf32>
    %201 = arith.addi %11, %170 : i32
    %202 = vector.broadcast %201 : i32 to vector<8x1xi32>
    %203 = arith.cmpi sgt, %5, %202 : vector<8x1xi32>
    %204 = vector.shape_cast %203 : vector<8x1xi1> to vector<8x1xi1>
    %205 = vector.broadcast %204 : vector<8x1xi1> to vector<8x16xi1>
    %206 = arith.select %205, %200, %155 : vector<8x16xi1>, vector<8x16xf32>
    %207 = vector.shape_cast %203 : vector<8x1xi1> to vector<8x1xi1>
    %208 = vector.broadcast %207 : vector<8x1xi1> to vector<8x16xi1>
    %209 = arith.select %208, %198, %158 : vector<8x16xi1>, vector<8x16xf32>
    %cst_58 = arith.constant 0.000000e+00 : f32
    %210 = vector.shape_cast %203 : vector<8x1xi1> to vector<8x1xi1>
    %211 = vector.broadcast %210 : vector<8x1xi1> to vector<8x16xi1>
    %212 = vector.broadcast %cst_58 : f32 to vector<8x16xf32>
    %213 = arith.select %211, %200, %212 : vector<8x16xi1>, vector<8x16xf32>
    %c0_59 = arith.constant 0 : index
    %214 = arith.index_cast %170 : i32 to index
    %c0_60 = arith.constant 0 : index
    %c0_61 = arith.constant 0 : index
    %215 = vector.load %arg5[%c0_59, %214, %c0_60, %c0_61] : memref<1x8x8x16xf32, #tpu.memory_space<vmem>>, vector<1x1x8x16xf32>
    %216 = vector.shape_cast %215 : vector<1x1x8x16xf32> to vector<8x16xf32>
    %217 = vector.shape_cast %213 : vector<8x16xf32> to vector<1x1x8x16xf32>
    tpu.vector_store %arg5[%c0_59, %214, %c0_60, %c0_61], %217 {strides = array<i32>} : memref<1x8x8x16xf32, #tpu.memory_space<vmem>>, vector<1x1x8x16xf32>,
    %c4_i32 = arith.constant 4 : i32
    %c2_i32_62 = arith.constant 2 : i32
    %218 = arith.muli %c2_i32_62, %c4_i32 : i32
    %c7_i32_63 = arith.constant 7 : i32
    %219 = arith.subi %c7_i32_63, %218 : i32
    %220 = arith.muli %arg0, %219 : i32
    %221 = arith.addi %220, %c4_i32 : i32
    %c0_64 = arith.constant 0 : index
    %222 = arith.index_cast %221 : i32 to index
    %c0_65 = arith.constant 0 : index
    %c0_66 = arith.constant 0 : index
    %223 = vector.load %arg2[%c0_64, %222, %c0_65, %c0_66] : memref<1x8x8x64xf32, #tpu.memory_space<vmem>>, vector<1x1x8x64xf32>
    %224 = vector.shape_cast %223 : vector<1x1x8x64xf32> to vector<8x64xf32>
    %cst_67 = arith.constant dense<0.000000e+00> : vector<8x64xf32>
    %225 = tpu.matmul %206, %4, %cst_67 {dimension_numbers = #tpu.dot_dimension_numbers<[1], [0], [0], [1], [0, 0, 1, 1], [], []>} : vector<8x16xf32>, vector<16x64xf32>, vector<8x64xf32> -> vector<8x64xf32>
    %226 = arith.addf %224, %225 : vector<8x64xf32>
    %227 = vector.extract_strided_slice %226 {offsets = [0, 0], sizes = [8, 16], strides = [1, 1]} : vector<8x64xf32> to vector<8x16xf32>
    %228 = arith.negf %227 : vector<8x16xf32>
    %229 = math.exp %228 : vector<8x16xf32>
    %cst_68 = arith.constant 1.000000e+00 : f32
    %230 = vector.broadcast %cst_68 : f32 to vector<8x16xf32>
    %231 = arith.addf %230, %229 : vector<8x16xf32>
    %232 = arith.divf %230, %231 : vector<8x16xf32>
    %233 = vector.extract_strided_slice %226 {offsets = [0, 16], sizes = [8, 16], strides = [1, 1]} : vector<8x64xf32> to vector<8x16xf32>
    %234 = arith.negf %233 : vector<8x16xf32>
    %235 = math.exp %234 : vector<8x16xf32>
    %cst_69 = arith.constant 1.000000e+00 : f32
    %236 = vector.broadcast %cst_69 : f32 to vector<8x16xf32>
    %237 = arith.addf %236, %235 : vector<8x16xf32>
    %238 = arith.divf %236, %237 : vector<8x16xf32>
    %239 = vector.extract_strided_slice %226 {offsets = [0, 32], sizes = [8, 16], strides = [1, 1]} : vector<8x64xf32> to vector<8x16xf32>
    %240 = math.tanh %239 : vector<8x16xf32>
    %241 = vector.extract_strided_slice %226 {offsets = [0, 48], sizes = [8, 16], strides = [1, 1]} : vector<8x64xf32> to vector<8x16xf32>
    %242 = arith.negf %241 : vector<8x16xf32>
    %243 = math.exp %242 : vector<8x16xf32>
    %cst_70 = arith.constant 1.000000e+00 : f32
    %244 = vector.broadcast %cst_70 : f32 to vector<8x16xf32>
    %245 = arith.addf %244, %243 : vector<8x16xf32>
    %246 = arith.divf %244, %245 : vector<8x16xf32>
    %247 = arith.mulf %238, %209 : vector<8x16xf32>
    %248 = arith.mulf %232, %240 : vector<8x16xf32>
    %249 = arith.addf %247, %248 : vector<8x16xf32>
    %250 = math.tanh %249 : vector<8x16xf32>
    %251 = arith.mulf %246, %250 : vector<8x16xf32>
    %252 = arith.addi %11, %221 : i32
    %253 = vector.broadcast %252 : i32 to vector<8x1xi32>
    %254 = arith.cmpi sgt, %5, %253 : vector<8x1xi32>
    %255 = vector.shape_cast %254 : vector<8x1xi1> to vector<8x1xi1>
    %256 = vector.broadcast %255 : vector<8x1xi1> to vector<8x16xi1>
    %257 = arith.select %256, %251, %206 : vector<8x16xi1>, vector<8x16xf32>
    %258 = vector.shape_cast %254 : vector<8x1xi1> to vector<8x1xi1>
    %259 = vector.broadcast %258 : vector<8x1xi1> to vector<8x16xi1>
    %260 = arith.select %259, %249, %209 : vector<8x16xi1>, vector<8x16xf32>
    %cst_71 = arith.constant 0.000000e+00 : f32
    %261 = vector.shape_cast %254 : vector<8x1xi1> to vector<8x1xi1>
    %262 = vector.broadcast %261 : vector<8x1xi1> to vector<8x16xi1>
    %263 = vector.broadcast %cst_71 : f32 to vector<8x16xf32>
    %264 = arith.select %262, %251, %263 : vector<8x16xi1>, vector<8x16xf32>
    %c0_72 = arith.constant 0 : index
    %265 = arith.index_cast %221 : i32 to index
    %c0_73 = arith.constant 0 : index
    %c0_74 = arith.constant 0 : index
    %266 = vector.load %arg5[%c0_72, %265, %c0_73, %c0_74] : memref<1x8x8x16xf32, #tpu.memory_space<vmem>>, vector<1x1x8x16xf32>
    %267 = vector.shape_cast %266 : vector<1x1x8x16xf32> to vector<8x16xf32>
    %268 = vector.shape_cast %264 : vector<8x16xf32> to vector<1x1x8x16xf32>
    tpu.vector_store %arg5[%c0_72, %265, %c0_73, %c0_74], %268 {strides = array<i32>} : memref<1x8x8x16xf32, #tpu.memory_space<vmem>>, vector<1x1x8x16xf32>,
    %c5_i32 = arith.constant 5 : i32
    %c2_i32_75 = arith.constant 2 : i32
    %269 = arith.muli %c2_i32_75, %c5_i32 : i32
    %c7_i32_76 = arith.constant 7 : i32
    %270 = arith.subi %c7_i32_76, %269 : i32
    %271 = arith.muli %arg0, %270 : i32
    %272 = arith.addi %271, %c5_i32 : i32
    %c0_77 = arith.constant 0 : index
    %273 = arith.index_cast %272 : i32 to index
    %c0_78 = arith.constant 0 : index
    %c0_79 = arith.constant 0 : index
    %274 = vector.load %arg2[%c0_77, %273, %c0_78, %c0_79] : memref<1x8x8x64xf32, #tpu.memory_space<vmem>>, vector<1x1x8x64xf32>
    %275 = vector.shape_cast %274 : vector<1x1x8x64xf32> to vector<8x64xf32>
    %cst_80 = arith.constant dense<0.000000e+00> : vector<8x64xf32>
    %276 = tpu.matmul %257, %4, %cst_80 {dimension_numbers = #tpu.dot_dimension_numbers<[1], [0], [0], [1], [0, 0, 1, 1], [], []>} : vector<8x16xf32>, vector<16x64xf32>, vector<8x64xf32> -> vector<8x64xf32>
    %277 = arith.addf %275, %276 : vector<8x64xf32>
    %278 = vector.extract_strided_slice %277 {offsets = [0, 0], sizes = [8, 16], strides = [1, 1]} : vector<8x64xf32> to vector<8x16xf32>
    %279 = arith.negf %278 : vector<8x16xf32>
    %280 = math.exp %279 : vector<8x16xf32>
    %cst_81 = arith.constant 1.000000e+00 : f32
    %281 = vector.broadcast %cst_81 : f32 to vector<8x16xf32>
    %282 = arith.addf %281, %280 : vector<8x16xf32>
    %283 = arith.divf %281, %282 : vector<8x16xf32>
    %284 = vector.extract_strided_slice %277 {offsets = [0, 16], sizes = [8, 16], strides = [1, 1]} : vector<8x64xf32> to vector<8x16xf32>
    %285 = arith.negf %284 : vector<8x16xf32>
    %286 = math.exp %285 : vector<8x16xf32>
    %cst_82 = arith.constant 1.000000e+00 : f32
    %287 = vector.broadcast %cst_82 : f32 to vector<8x16xf32>
    %288 = arith.addf %287, %286 : vector<8x16xf32>
    %289 = arith.divf %287, %288 : vector<8x16xf32>
    %290 = vector.extract_strided_slice %277 {offsets = [0, 32], sizes = [8, 16], strides = [1, 1]} : vector<8x64xf32> to vector<8x16xf32>
    %291 = math.tanh %290 : vector<8x16xf32>
    %292 = vector.extract_strided_slice %277 {offsets = [0, 48], sizes = [8, 16], strides = [1, 1]} : vector<8x64xf32> to vector<8x16xf32>
    %293 = arith.negf %292 : vector<8x16xf32>
    %294 = math.exp %293 : vector<8x16xf32>
    %cst_83 = arith.constant 1.000000e+00 : f32
    %295 = vector.broadcast %cst_83 : f32 to vector<8x16xf32>
    %296 = arith.addf %295, %294 : vector<8x16xf32>
    %297 = arith.divf %295, %296 : vector<8x16xf32>
    %298 = arith.mulf %289, %260 : vector<8x16xf32>
    %299 = arith.mulf %283, %291 : vector<8x16xf32>
    %300 = arith.addf %298, %299 : vector<8x16xf32>
    %301 = math.tanh %300 : vector<8x16xf32>
    %302 = arith.mulf %297, %301 : vector<8x16xf32>
    %303 = arith.addi %11, %272 : i32
    %304 = vector.broadcast %303 : i32 to vector<8x1xi32>
    %305 = arith.cmpi sgt, %5, %304 : vector<8x1xi32>
    %306 = vector.shape_cast %305 : vector<8x1xi1> to vector<8x1xi1>
    %307 = vector.broadcast %306 : vector<8x1xi1> to vector<8x16xi1>
    %308 = arith.select %307, %302, %257 : vector<8x16xi1>, vector<8x16xf32>
    %309 = vector.shape_cast %305 : vector<8x1xi1> to vector<8x1xi1>
    %310 = vector.broadcast %309 : vector<8x1xi1> to vector<8x16xi1>
    %311 = arith.select %310, %300, %260 : vector<8x16xi1>, vector<8x16xf32>
    %cst_84 = arith.constant 0.000000e+00 : f32
    %312 = vector.shape_cast %305 : vector<8x1xi1> to vector<8x1xi1>
    %313 = vector.broadcast %312 : vector<8x1xi1> to vector<8x16xi1>
    %314 = vector.broadcast %cst_84 : f32 to vector<8x16xf32>
    %315 = arith.select %313, %302, %314 : vector<8x16xi1>, vector<8x16xf32>
    %c0_85 = arith.constant 0 : index
    %316 = arith.index_cast %272 : i32 to index
    %c0_86 = arith.constant 0 : index
    %c0_87 = arith.constant 0 : index
    %317 = vector.load %arg5[%c0_85, %316, %c0_86, %c0_87] : memref<1x8x8x16xf32, #tpu.memory_space<vmem>>, vector<1x1x8x16xf32>
    %318 = vector.shape_cast %317 : vector<1x1x8x16xf32> to vector<8x16xf32>
    %319 = vector.shape_cast %315 : vector<8x16xf32> to vector<1x1x8x16xf32>
    tpu.vector_store %arg5[%c0_85, %316, %c0_86, %c0_87], %319 {strides = array<i32>} : memref<1x8x8x16xf32, #tpu.memory_space<vmem>>, vector<1x1x8x16xf32>,
    %c6_i32 = arith.constant 6 : i32
    %c2_i32_88 = arith.constant 2 : i32
    %320 = arith.muli %c2_i32_88, %c6_i32 : i32
    %c7_i32_89 = arith.constant 7 : i32
    %321 = arith.subi %c7_i32_89, %320 : i32
    %322 = arith.muli %arg0, %321 : i32
    %323 = arith.addi %322, %c6_i32 : i32
    %c0_90 = arith.constant 0 : index
    %324 = arith.index_cast %323 : i32 to index
    %c0_91 = arith.constant 0 : index
    %c0_92 = arith.constant 0 : index
    %325 = vector.load %arg2[%c0_90, %324, %c0_91, %c0_92] : memref<1x8x8x64xf32, #tpu.memory_space<vmem>>, vector<1x1x8x64xf32>
    %326 = vector.shape_cast %325 : vector<1x1x8x64xf32> to vector<8x64xf32>
    %cst_93 = arith.constant dense<0.000000e+00> : vector<8x64xf32>
    %327 = tpu.matmul %308, %4, %cst_93 {dimension_numbers = #tpu.dot_dimension_numbers<[1], [0], [0], [1], [0, 0, 1, 1], [], []>} : vector<8x16xf32>, vector<16x64xf32>, vector<8x64xf32> -> vector<8x64xf32>
    %328 = arith.addf %326, %327 : vector<8x64xf32>
    %329 = vector.extract_strided_slice %328 {offsets = [0, 0], sizes = [8, 16], strides = [1, 1]} : vector<8x64xf32> to vector<8x16xf32>
    %330 = arith.negf %329 : vector<8x16xf32>
    %331 = math.exp %330 : vector<8x16xf32>
    %cst_94 = arith.constant 1.000000e+00 : f32
    %332 = vector.broadcast %cst_94 : f32 to vector<8x16xf32>
    %333 = arith.addf %332, %331 : vector<8x16xf32>
    %334 = arith.divf %332, %333 : vector<8x16xf32>
    %335 = vector.extract_strided_slice %328 {offsets = [0, 16], sizes = [8, 16], strides = [1, 1]} : vector<8x64xf32> to vector<8x16xf32>
    %336 = arith.negf %335 : vector<8x16xf32>
    %337 = math.exp %336 : vector<8x16xf32>
    %cst_95 = arith.constant 1.000000e+00 : f32
    %338 = vector.broadcast %cst_95 : f32 to vector<8x16xf32>
    %339 = arith.addf %338, %337 : vector<8x16xf32>
    %340 = arith.divf %338, %339 : vector<8x16xf32>
    %341 = vector.extract_strided_slice %328 {offsets = [0, 32], sizes = [8, 16], strides = [1, 1]} : vector<8x64xf32> to vector<8x16xf32>
    %342 = math.tanh %341 : vector<8x16xf32>
    %343 = vector.extract_strided_slice %328 {offsets = [0, 48], sizes = [8, 16], strides = [1, 1]} : vector<8x64xf32> to vector<8x16xf32>
    %344 = arith.negf %343 : vector<8x16xf32>
    %345 = math.exp %344 : vector<8x16xf32>
    %cst_96 = arith.constant 1.000000e+00 : f32
    %346 = vector.broadcast %cst_96 : f32 to vector<8x16xf32>
    %347 = arith.addf %346, %345 : vector<8x16xf32>
    %348 = arith.divf %346, %347 : vector<8x16xf32>
    %349 = arith.mulf %340, %311 : vector<8x16xf32>
    %350 = arith.mulf %334, %342 : vector<8x16xf32>
    %351 = arith.addf %349, %350 : vector<8x16xf32>
    %352 = math.tanh %351 : vector<8x16xf32>
    %353 = arith.mulf %348, %352 : vector<8x16xf32>
    %354 = arith.addi %11, %323 : i32
    %355 = vector.broadcast %354 : i32 to vector<8x1xi32>
    %356 = arith.cmpi sgt, %5, %355 : vector<8x1xi32>
    %357 = vector.shape_cast %356 : vector<8x1xi1> to vector<8x1xi1>
    %358 = vector.broadcast %357 : vector<8x1xi1> to vector<8x16xi1>
    %359 = arith.select %358, %353, %308 : vector<8x16xi1>, vector<8x16xf32>
    %360 = vector.shape_cast %356 : vector<8x1xi1> to vector<8x1xi1>
    %361 = vector.broadcast %360 : vector<8x1xi1> to vector<8x16xi1>
    %362 = arith.select %361, %351, %311 : vector<8x16xi1>, vector<8x16xf32>
    %cst_97 = arith.constant 0.000000e+00 : f32
    %363 = vector.shape_cast %356 : vector<8x1xi1> to vector<8x1xi1>
    %364 = vector.broadcast %363 : vector<8x1xi1> to vector<8x16xi1>
    %365 = vector.broadcast %cst_97 : f32 to vector<8x16xf32>
    %366 = arith.select %364, %353, %365 : vector<8x16xi1>, vector<8x16xf32>
    %c0_98 = arith.constant 0 : index
    %367 = arith.index_cast %323 : i32 to index
    %c0_99 = arith.constant 0 : index
    %c0_100 = arith.constant 0 : index
    %368 = vector.load %arg5[%c0_98, %367, %c0_99, %c0_100] : memref<1x8x8x16xf32, #tpu.memory_space<vmem>>, vector<1x1x8x16xf32>
    %369 = vector.shape_cast %368 : vector<1x1x8x16xf32> to vector<8x16xf32>
    %370 = vector.shape_cast %366 : vector<8x16xf32> to vector<1x1x8x16xf32>
    tpu.vector_store %arg5[%c0_98, %367, %c0_99, %c0_100], %370 {strides = array<i32>} : memref<1x8x8x16xf32, #tpu.memory_space<vmem>>, vector<1x1x8x16xf32>,
    %c7_i32_101 = arith.constant 7 : i32
    %c2_i32_102 = arith.constant 2 : i32
    %371 = arith.muli %c2_i32_102, %c7_i32_101 : i32
    %c7_i32_103 = arith.constant 7 : i32
    %372 = arith.subi %c7_i32_103, %371 : i32
    %373 = arith.muli %arg0, %372 : i32
    %374 = arith.addi %373, %c7_i32_101 : i32
    %c0_104 = arith.constant 0 : index
    %375 = arith.index_cast %374 : i32 to index
    %c0_105 = arith.constant 0 : index
    %c0_106 = arith.constant 0 : index
    %376 = vector.load %arg2[%c0_104, %375, %c0_105, %c0_106] : memref<1x8x8x64xf32, #tpu.memory_space<vmem>>, vector<1x1x8x64xf32>
    %377 = vector.shape_cast %376 : vector<1x1x8x64xf32> to vector<8x64xf32>
    %cst_107 = arith.constant dense<0.000000e+00> : vector<8x64xf32>
    %378 = tpu.matmul %359, %4, %cst_107 {dimension_numbers = #tpu.dot_dimension_numbers<[1], [0], [0], [1], [0, 0, 1, 1], [], []>} : vector<8x16xf32>, vector<16x64xf32>, vector<8x64xf32> -> vector<8x64xf32>
    %379 = arith.addf %377, %378 : vector<8x64xf32>
    %380 = vector.extract_strided_slice %379 {offsets = [0, 0], sizes = [8, 16], strides = [1, 1]} : vector<8x64xf32> to vector<8x16xf32>
    %381 = arith.negf %380 : vector<8x16xf32>
    %382 = math.exp %381 : vector<8x16xf32>
    %cst_108 = arith.constant 1.000000e+00 : f32
    %383 = vector.broadcast %cst_108 : f32 to vector<8x16xf32>
    %384 = arith.addf %383, %382 : vector<8x16xf32>
    %385 = arith.divf %383, %384 : vector<8x16xf32>
    %386 = vector.extract_strided_slice %379 {offsets = [0, 16], sizes = [8, 16], strides = [1, 1]} : vector<8x64xf32> to vector<8x16xf32>
    %387 = arith.negf %386 : vector<8x16xf32>
    %388 = math.exp %387 : vector<8x16xf32>
    %cst_109 = arith.constant 1.000000e+00 : f32
    %389 = vector.broadcast %cst_109 : f32 to vector<8x16xf32>
    %390 = arith.addf %389, %388 : vector<8x16xf32>
    %391 = arith.divf %389, %390 : vector<8x16xf32>
    %392 = vector.extract_strided_slice %379 {offsets = [0, 32], sizes = [8, 16], strides = [1, 1]} : vector<8x64xf32> to vector<8x16xf32>
    %393 = math.tanh %392 : vector<8x16xf32>
    %394 = vector.extract_strided_slice %379 {offsets = [0, 48], sizes = [8, 16], strides = [1, 1]} : vector<8x64xf32> to vector<8x16xf32>
    %395 = arith.negf %394 : vector<8x16xf32>
    %396 = math.exp %395 : vector<8x16xf32>
    %cst_110 = arith.constant 1.000000e+00 : f32
    %397 = vector.broadcast %cst_110 : f32 to vector<8x16xf32>
    %398 = arith.addf %397, %396 : vector<8x16xf32>
    %399 = arith.divf %397, %398 : vector<8x16xf32>
    %400 = arith.mulf %391, %362 : vector<8x16xf32>
    %401 = arith.mulf %385, %393 : vector<8x16xf32>
    %402 = arith.addf %400, %401 : vector<8x16xf32>
    %403 = math.tanh %402 : vector<8x16xf32>
    %404 = arith.mulf %399, %403 : vector<8x16xf32>
    %405 = arith.addi %11, %374 : i32
    %406 = vector.broadcast %405 : i32 to vector<8x1xi32>
    %407 = arith.cmpi sgt, %5, %406 : vector<8x1xi32>
    %408 = vector.shape_cast %407 : vector<8x1xi1> to vector<8x1xi1>
    %409 = vector.broadcast %408 : vector<8x1xi1> to vector<8x16xi1>
    %410 = arith.select %409, %404, %359 : vector<8x16xi1>, vector<8x16xf32>
    %411 = vector.shape_cast %407 : vector<8x1xi1> to vector<8x1xi1>
    %412 = vector.broadcast %411 : vector<8x1xi1> to vector<8x16xi1>
    %413 = arith.select %412, %402, %362 : vector<8x16xi1>, vector<8x16xf32>
    %cst_111 = arith.constant 0.000000e+00 : f32
    %414 = vector.shape_cast %407 : vector<8x1xi1> to vector<8x1xi1>
    %415 = vector.broadcast %414 : vector<8x1xi1> to vector<8x16xi1>
    %416 = vector.broadcast %cst_111 : f32 to vector<8x16xf32>
    %417 = arith.select %415, %404, %416 : vector<8x16xi1>, vector<8x16xf32>
    %c0_112 = arith.constant 0 : index
    %418 = arith.index_cast %374 : i32 to index
    %c0_113 = arith.constant 0 : index
    %c0_114 = arith.constant 0 : index
    %419 = vector.load %arg5[%c0_112, %418, %c0_113, %c0_114] : memref<1x8x8x16xf32, #tpu.memory_space<vmem>>, vector<1x1x8x16xf32>
    %420 = vector.shape_cast %419 : vector<1x1x8x16xf32> to vector<8x16xf32>
    %421 = vector.shape_cast %417 : vector<8x16xf32> to vector<1x1x8x16xf32>
    tpu.vector_store %arg5[%c0_112, %418, %c0_113, %c0_114], %421 {strides = array<i32>} : memref<1x8x8x16xf32, #tpu.memory_space<vmem>>, vector<1x1x8x16xf32>,
    %c8_i32_115 = arith.constant 8 : i32
    %c0_116 = arith.constant 0 : index
    %c0_117 = arith.constant 0 : index
    %422 = vector.load %arg7[%c0_116, %c0_117] : memref<8x16xf32, #tpu.memory_space<vmem>>, vector<8x16xf32>
    tpu.vector_store %arg7[%c0_116, %c0_117], %410 {strides = array<i32>} : memref<8x16xf32, #tpu.memory_space<vmem>>, vector<8x16xf32>,
    %c0_118 = arith.constant 0 : index
    %c0_119 = arith.constant 0 : index
    %423 = vector.load %arg8[%c0_118, %c0_119] : memref<8x16xf32, #tpu.memory_space<vmem>>, vector<8x16xf32>
    tpu.vector_store %arg8[%c0_118, %c0_119], %413 {strides = array<i32>} : memref<8x16xf32, #tpu.memory_space<vmem>>, vector<8x16xf32>,
    %c0_120 = arith.constant 0 : index
    %c0_121 = arith.constant 0 : index
    %c0_122 = arith.constant 0 : index
    %424 = vector.load %arg6[%c0_120, %c0_121, %c0_122] : memref<1x8x16xf32, #tpu.memory_space<vmem>>, vector<1x8x16xf32>
    %425 = vector.shape_cast %424 : vector<1x8x16xf32> to vector<8x16xf32>
    %426 = vector.shape_cast %410 : vector<8x16xf32> to vector<1x8x16xf32>
    tpu.vector_store %arg6[%c0_120, %c0_121, %c0_122], %426 {strides = array<i32>} : memref<1x8x16xf32, #tpu.memory_space<vmem>>, vector<1x8x16xf32>,
    return
  }
  func.func @transform_0(%arg0: i32, %arg1: i32) -> (i32, i32, i32, i32) {
    %c0_i32 = arith.constant 0 : i32
    %0 = arith.subi %c0_i32, %arg1 : i32
    %1 = arith.muli %arg0, %0 : i32
    %c1_i32 = arith.constant 1 : i32
    %2 = arith.subi %c1_i32, %arg0 : i32
    %3 = arith.muli %2, %arg1 : i32
    %4 = arith.addi %1, %3 : i32
    %c0_i32_0 = arith.constant 0 : i32
    %c0_i32_1 = arith.constant 0 : i32
    %c0_i32_2 = arith.constant 0 : i32
    return %arg0, %4, %c0_i32_0, %c0_i32_1 : i32, i32, i32, i32
  }
  func.func @transform_1(%arg0: i32, %arg1: i32) -> (i32, i32) {
    %c0_i32 = arith.constant 0 : i32
    %c0_i32_0 = arith.constant 0 : i32
    %c0_i32_1 = arith.constant 0 : i32
    return %c0_i32, %c0_i32_0 : i32, i32
  }
  func.func @transform_2(%arg0: i32, %arg1: i32) -> (i32, i32, i32) {
    %c0_i32 = arith.constant 0 : i32
    %c0_i32_0 = arith.constant 0 : i32
    %c0_i32_1 = arith.constant 0 : i32
    return %arg0, %c0_i32, %c0_i32_0 : i32, i32, i32
  }
  func.func @transform_3(%arg0: i32, %arg1: i32) -> (i32, i32, i32, i32) {
    %c0_i32 = arith.constant 0 : i32
    %0 = arith.subi %c0_i32, %arg1 : i32
    %1 = arith.muli %arg0, %0 : i32
    %c1_i32 = arith.constant 1 : i32
    %2 = arith.subi %c1_i32, %arg0 : i32
    %3 = arith.muli %2, %arg1 : i32
    %4 = arith.addi %1, %3 : i32
    %c0_i32_0 = arith.constant 0 : i32
    %c0_i32_1 = arith.constant 0 : i32
    %c0_i32_2 = arith.constant 0 : i32
    return %arg0, %4, %c0_i32_0, %c0_i32_1 : i32, i32, i32, i32
  }
  func.func @transform_4(%arg0: i32, %arg1: i32) -> (i32, i32, i32) {
    %c0_i32 = arith.constant 0 : i32
    %c0_i32_0 = arith.constant 0 : i32
    %c0_i32_1 = arith.constant 0 : i32
    return %arg0, %c0_i32, %c0_i32_0 : i32, i32, i32
  }
}

</mosaic_0001>

<bundles_post_ra>
// kernel: bilstm_forward.1
= control target key start
LH: loop header
LB: loop body
LE: loop exit
PB: predicated region body
PF: predicated region fallthrough
CT: control target
= control target key end

     0   :  { %s1857_s15 = smov 0   ;;  %s1859_s16 = smov 0   ;;  %s2185_s0 = inlined_call_operand.vmem [shape: f32[2,8,8,64], index: 0, kind: input, shape index: {}]   ;;  %s2186_s1 = inlined_call_operand.vmem [shape: s32[8,1], index: 1, kind: input, shape index: {}]   ;;  %s2187_s2 = inlined_call_operand.vmem [shape: f32[2,16,64], index: 2, kind: input, shape index: {}]   ;;  %s2188_s3 = inlined_call_operand.vmem [shape: f32[2,8,8,16], index: 3, kind: output, shape index: {0}]   ;;  %s2189_s4 = inlined_call_operand.vmem [shape: f32[2,8,16], index: 4, kind: output, shape index: {1}]  }
   0x1   :  { %s1861_s17 = smov 0  }
   0x2 LB: > { %s27_s18 = sadd.s32 1, %s1816_s16  ;;  %p1539_p0 = scmp.ge.s32.totalorder %s1820_s17, 1  ;;  %s1820_s17 = sphi %s1861_s17, %s15_s17   ;;  %s1816_s16 = sphi %s1859_s16, %s2191_s16   ;;  %s1812_s15 = sphi %s1857_s15, %s2190_s15  }
   0x3   : > { %p29_p1 = scmp.ge.s32.totalorder %s27_s18, 2  ;;  %p226_p2 = scmp.lt.s32.totalorder %s1820_s17, 3 }
   0x5   : > { %s2193_s18 = smov (%p29_p1, %s27_s18), 0  ;;  %p227_p3 = pnand %p1539_p0, %p226_p2 }
   0x6   : > { %p285_p4 = scmp.lt.s32.totalorder (!%p227_p3), %s1812_s15, 1  ;;  %vm332_vm0 = vcmask (!%p227_p3), 130048   ;;  %v1822_v0 = vmov (!%p227_p3), 0.0|0.0   ;;  %vm1823_vm1 = vmmov (!%p227_p3), 0   ;;  %v1824_v1 = vmov (!%p227_p3), 0.0   ;;  %s1547_s25 = smul.u32 (!%p227_p3), 56, %s1812_s15 }
   0x7   : > { %230 = sbr.rel (%p227_p3) target bundleno = 5653 (0x1615), region = 32  ;;  %1674 = vmatprep.subr.bf16.mxu0 (!%p227_p3), %v1822_v0  ;;  %1622 = vmatprep.mubr.msk.f32.mxu0 (!%p227_p3), %vm1823_vm1, %v1824_v1  ;;  %333 = vst.msk [vmem:[#allocation2] sm:$0xff] (!%p227_p3), %vm332_vm0, %v1824_v1  ;;  %334 = vst.msk [vmem:[#allocation3] sm:$0xff] (!%p227_p3), %vm332_vm0, %v1824_v1  ;;  %v1825_v10 = vmov (!%p227_p3), 0   ;;  %s1826_s30 = smov (!%p227_p3), 96   ;;  %v1926_v16 = vld [vmem:[%s2186_s1] sm:$0xff] (!%p227_p3) }
   0x8   : > { %1677 = vmatprep.subr.bf16.mxu1 (!%p227_p3), %v1822_v0  ;;  %1629 = vmatprep.mubr.msk.f32.mxu1 (!%p227_p3), %vm1823_vm1, %v1824_v1  ;;  %s1827_s5 = smov (!%p227_p3), 16   ;;  %s346_s6 = smul.u32 (!%p227_p3), 7, %s1812_s15 }
   0x9   : > { %1732 = vset.pattern.permute.xlu1 (!%p227_p3), %v1825_v10  ;;  %1733 = vset.pattern.permute.xlu0 (!%p227_p3), %v1825_v10  ;;  %s1828_s9 = smov (!%p227_p3), 48   ;;  %s1829_s10 = smov (!%p227_p3), 32  }
   0xa   : > { %v454_v17 = vstv (!%p227_p3), %s346_s6  ;;  %s1830_s11 = smov (!%p227_p3), 80   ;;  %s1550_s12 = smul.u32 (!%p227_p3), 40, %s1812_s15 }
   0xb   : > { %vm455_vm2 = vcmp.gt.s32.totalorder (!%p227_p3), %v1926_v16, %v454_v17  ;;  %s473_s14 = smul.u32 (!%p227_p3), 5, %s1812_s15  ;;  %s1562_s27 = sshll.u32 (!%p227_p3), %s1812_s15, 3 }
   0xc   : > { %v456_v21 = vsel (!%p227_p3), %vm455_vm2, 1, %v1825_v10  ;;  %s1556_s21 = smul.u32 (!%p227_p3), 24, %s1812_s15  ;;  %s717_s6 = sadd.s32 (!%p227_p3), 3, %s1812_s15 }
   0xd   : > { %s838_s7 = ssub.s32 (!%p227_p3), 4, %s1812_s15 }
   0xe   : > { %s1886_s19 = scalar_select %p285_p4, %s1812_s15, 1  ;;  %v344_v5 = vld [vmem:[#allocation2] sm:$0xff]  ;;  %v345_v12 = vld [vmem:[#allocation3] sm:$0xff] }
   0xf   : > { %s2024_s8 = sshll.u32 %s838_s7, 3 }
  0x10   : > { %s1592_s20 = sshll.u32 %s1886_s19, 4  ;;  %s1591_s24 = sshll.u32 %s1886_s19, 6 }
  0x11   : > { %s303_s23 = scalar_lea.vmem %s2187_s2, %s1592_s20  ;;  %s1913_s28 = scalar_lea.vmem %s2185_s0, %s1591_s24 }
  0x12   : > { %v335_v2 = vld [vmem:[%s303_s23] sm:$0xff]  ;;  %v336_v3 = vld [vmem:[%s303_s23 + $0x8] sm:$0xff]  ;;  %s348_s29 = scalar_lea.vmem %s1913_s28, %s1547_s25  ;;  %s1431_s13 = scalar_lea.vmem %s1913_s28, %s1550_s12 }
  0x13   : > { %v1895_v4 = vpack.c.bf16 %v336_v3, %v335_v2  ;;  %v349_v6 = vld [vmem:[%s348_s29] sm:$0xff]  ;;  %v1551_v33 = vld [vmem:[%s1431_s13 + $0x8] sm:$0xff]  ;;  %s474_s20 = sadd.s32 1, %s473_s14  ;;  %s1439_s22 = scalar_lea.vmem %s1913_s28, %s1556_s21 }
  0x14   : > { %v579_v37 = vstv %s474_s20  ;;  %v1557_v56 = vld [vmem:[%s1439_s22 + $0x10] sm:$0xff]  ;;  %s595_s23 = smul.u32 3, %s1812_s15  ;;  %s1446_s29 = scalar_lea.vmem %s1913_s28, %s1562_s27 }
  0x15   : > { %1676 = vmatpush3.bf16.msra.mxu0 %v1895_v4  ;;  %1679 = vmatpush3.bf16.msra.mxu1 %v1895_v4  ;;  %vm580_vm4 = vcmp.gt.s32.totalorder %v1926_v16, %v579_v37  ;;  %s1571_s13 = smul.u32 4294967272, %s1812_s15 }
  0x16   : > { %1680 = vmatprep.subr.bf16.mxu0 %v1822_v0  ;;  %1683 = vmatprep.subr.bf16.mxu1 %v1822_v0  ;;  %v581_v39 = vsel %vm580_vm4, 1, %v1825_v10  ;;  %s596_s26 = sadd.s32 2, %s595_s23  ;;  %s959_s20 = smul.u32 4294967293, %s1812_s15 }
  0x17   : > { %v701_v60 = vstv %s596_s26  ;;  %s1457_s14 = scalar_lea.vmem %s1913_s28, %s1571_s13  ;;  %s1577_s23 = smul.u32 4294967256, %s1812_s15 }
  0x18   : > { %1623 = vmatmul.mubr.msk.f32.vlgmr.msra.gmra.mrb[0].mxu0 %vm332_vm0, %v344_v5  ;;  %vm702_vm6 = vcmp.gt.s32.totalorder %v1926_v16, %v701_v60  ;;  %s960_s22 = sadd.s32 5, %s959_s20 }
  0x19   : > { %1682 = vmatpush3.bf16.msra.mxu0 %v1895_v4  ;;  %1636 = vmatprep.mubr.msk.f32.mxu0 %vm1823_vm1, %v1824_v1  ;;  %v703_v62 = vsel %vm702_vm6, 1, %v1825_v10  ;;  %s1465_s26 = scalar_lea.vmem %s1913_s28, %s1577_s23 }
  0x1a   : > { %1686 = vmatprep.subr.bf16.mxu0 %v1822_v0 }
  0xeb   : > { %v420_v7 = vpop.f32.mrb[0].mxu0 }
  0xec   : > { %v424_v8 = vadd.f32 %v420_v7, %v349_v6  ;;  %v1624_v9 = vpop.f32.mrb[1].mxu0 }
  0xee   : > { %1734 = vtanh.f32 %v424_v8  ;;  %v1549_v13 = vmul.f32 -1.442695, %v424_v8 }
  0xf0   : > { %1736 = vpow2.f32 %v1549_v13 }
  0xf8   : > { %v1735_v11 = vpop.eup %1734 }
  0xf9   : > { %438 = vrot.lane.b32.xlu0 %v1735_v11, %s1826_s30 }
  0xfa   : > { %v1737_v14 = vpop.eup %1736 }
  0xfb   : > { %v428_v15 = vadd.f32 1.0, %v1737_v14 }
  0xfd   : > { %433 = vrot.lane.b32.xlu0 %v345_v12, %s1827_s5  ;;  %1738 = vrcp.f32 %v428_v15 }
 0x107   : > { %v1739_v18 = vpop.eup %1738 }
 0x16b   : > { %v439_v19 = vpop.permute.xlu0 %438 }
 0x16c   : > { %v441_v20 = vmul.f32 %v1739_v18, %v439_v19 }
 0x16e   : > { %443 = vrot.lane.b32.xlu1 %v441_v20, %s1827_s5  ;;  %v1563_v20 = vld [vmem:[%s1446_s29 + $0x18] sm:$0xff]  ;;  %s1081_s29 = smul.u32 4294967291, %s1812_s15 }
 0x16f   : > { %v434_v22 = vpop.permute.xlu0 %433 }
 0x170   : > { %v436_v23 = vmul.f32 %v1739_v18, %v434_v22 }
 0x172   : > { %458 = vperm.xlu1 %1732, %v456_v21  }
 0x176   : > { %461 = vrot.lane.b32.xlu1 %v344_v5, %s1828_s9  ;;  %s840_s9 = scalar_lea.vmem %s1913_s28, %s2024_s8 }
 0x1e0   : > { %v444_v24 = vpop.permute.xlu1 %443 }
 0x1e1   : > { %v446_v25 = vadd.f32 %v444_v24, %v436_v23  ;;  %v822_v24 = vstv %s717_s6  ;;  %s1082_s6 = sadd.s32 6, %s1081_s29 }
 0x1e2   : > { %vm823_vm8 = vcmp.gt.s32.totalorder %v1926_v16, %v822_v24 }
 0x1e3   : > { %1740 = vtanh.f32 %v446_v25 }
 0x1ed   : > { %v1741_v26 = vpop.eup %1740 }
 0x1ee   : > { %449 = vrot.lane.b32.xlu0 %v1741_v26, %s1829_s10  ;;  %v824_v26 = vsel %vm823_vm8, 1, %v1825_v10 }
 0x1f1   : > { %v1932_v27 = vpop.permute.xlu1 %458 }
 0x1f2   : > { %vm460_vm3 = vcmp.eq.s32.totalorder %v1932_v27, 1 }
 0x1f3   : > { %v465_v46 = vsel %vm460_vm3, %v446_v25, %v434_v22 }
 0x1f5   : > { %v462_v29 = vpop.permute.xlu1 %461 }
 0x260   : > { %v450_v28 = vpop.permute.xlu0 %449 }
 0x261   : > { %v1934_v30 = vmul.f32 %v1739_v18, %v450_v28 }
 0x263   : > { %v464_v31 = vsel %vm460_vm3, %v1934_v30, %v462_v29 }
 0x264   : > { %479 = vrot.lane.b32.xlu0 %v464_v31, %s1830_s11 }
 0x2d6   : > { %v480_v32 = vpop.permute.xlu0 %479 }
 0x2d7   : > { %1630 = vmatmul.mubr.msk.f32.vlgmr.msra.gmra.mrb[0].mxu1 %vm332_vm0, %v480_v32 }
 0x2d8   : > { %1685 = vmatpush3.bf16.msra.mxu1 %v1895_v4  ;;  %1643 = vmatprep.mubr.msk.f32.mxu1 %vm1823_vm1, %v1824_v1 }
 0x2d9   : > { %1689 = vmatprep.subr.bf16.mxu1 %v1822_v0 }
 0x3aa   : > { %v549_v34 = vpop.f32.mrb[0].mxu1 }
 0x3ab   : > { %v553_v35 = vadd.f32 %v1551_v33, %v549_v34  ;;  %v1631_v36 = vpop.f32.mrb[1].mxu1 }
 0x3ad   : > { %1742 = vtanh.f32 %v553_v35  ;;  %v1553_v40 = vmul.f32 -1.442695, %v553_v35 }
 0x3af   : > { %1744 = vpow2.f32 %v1553_v40 }
 0x3b7   : > { %v1743_v38 = vpop.eup %1742 }
 0x3b8   : > { %563 = vrot.lane.b32.xlu1 %v1743_v38, %s1826_s30 }
 0x3b9   : > { %v1745_v41 = vpop.eup %1744 }
 0x3ba   : > { %v557_v42 = vadd.f32 1.0, %v1745_v41 }
 0x3bc   : > { %583 = vperm.xlu1 %1732, %v581_v39   ;;  %1746 = vrcp.f32 %v557_v42 }
 0x3c6   : > { %v1747_v43 = vpop.eup %1746 }
 0x3c7   : > { %v561_v47 = vmul.f32 %v1747_v43, %v465_v46 }
 0x42a   : > { %v564_v44 = vpop.permute.xlu1 %563 }
 0x42b   : > { %v566_v45 = vmul.f32 %v1747_v43, %v564_v44  ;;  %v841_v44 = vld [vmem:[%s840_s9] sm:$0xff] }
 0x42d   : > { %568 = vrot.lane.b32.xlu0 %v566_v45, %s1827_s5 }
 0x43b   : > { %v1958_v51 = vpop.permute.xlu1 %583 }
 0x43c   : > { %vm585_vm5 = vcmp.eq.s32.totalorder %v1958_v51, 1 }
 0x49f   : > { %v569_v48 = vpop.permute.xlu0 %568 }
 0x4a0   : > { %v571_v49 = vadd.f32 %v569_v48, %v561_v47  ;;  %v943_v48 = vstv %s838_s7  ;;  %s1583_s7 = smul.u32 4294967240, %s1812_s15 }
 0x4a1   : > { %vm944_vm10 = vcmp.gt.s32.totalorder %v1926_v16, %v943_v48 }
 0x4a2   : > { %1748 = vtanh.f32 %v571_v49  ;;  %v587_v8 = vsel %vm585_vm5, %v571_v49, %v465_v46  ;;  %s1473_s9 = scalar_lea.vmem %s1913_s28, %s1583_s7 }
 0x4ac   : > { %v1749_v50 = vpop.eup %1748 }
 0x4ad   : > { %574 = vrot.lane.b32.xlu0 %v1749_v50, %s1829_s10  ;;  %v945_v50 = vsel %vm944_vm10, 1, %v1825_v10 }
 0x51f   : > { %v575_v52 = vpop.permute.xlu0 %574 }
 0x520   : > { %v1960_v53 = vmul.f32 %v1747_v43, %v575_v52 }
 0x522   : > { %v586_v54 = vsel %vm585_vm5, %v1960_v53, %v464_v31 }
 0x523   : > { %601 = vrot.lane.b32.xlu1 %v586_v54, %s1830_s11 }
 0x595   : > { %v602_v55 = vpop.permute.xlu1 %601 }
 0x596   : > { %1637 = vmatmul.mubr.msk.f32.vlgmr.msra.gmra.mrb[2].mxu0 %vm332_vm0, %v602_v55 }
 0x597   : > { %1688 = vmatpush3.bf16.msra.mxu0 %v1895_v4  ;;  %1650 = vmatprep.mubr.msk.f32.mxu0 %vm1823_vm1, %v1824_v1 }
 0x598   : > { %1692 = vmatprep.subr.bf16.mxu0 %v1822_v0 }
 0x669   : > { %v671_v57 = vpop.f32.mrb[2].mxu0 }
 0x66a   : > { %v675_v58 = vadd.f32 %v1557_v56, %v671_v57  ;;  %v1638_v59 = vpop.f32.mrb[3].mxu0 }
 0x66c   : > { %1750 = vtanh.f32 %v675_v58  ;;  %v1559_v63 = vmul.f32 -1.442695, %v675_v58 }
 0x66e   : > { %1752 = vpow2.f32 %v1559_v63 }
 0x676   : > { %v1751_v61 = vpop.eup %1750 }
 0x677   : > { %685 = vrot.lane.b32.xlu0 %v1751_v61, %s1826_s30 }
 0x678   : > { %v1753_v2 = vpop.eup %1752 }
 0x679   : > { %v679_v3 = vadd.f32 1.0, %v1753_v2 }
 0x67b   : > { %705 = vperm.xlu0 %1733, %v703_v62   ;;  %1754 = vrcp.f32 %v679_v3 }
 0x685   : > { %v1755_v5 = vpop.eup %1754 }
 0x686   : > { %v683_v9 = vmul.f32 %v1755_v5, %v587_v8 }
 0x6e9   : > { %v686_v6 = vpop.permute.xlu0 %685 }
 0x6ea   : > { %v688_v7 = vmul.f32 %v1755_v5, %v686_v6 }
 0x6ec   : > { %690 = vrot.lane.b32.xlu1 %v688_v7, %s1827_s5 }
 0x6fa   : > { %v1984_v14 = vpop.permute.xlu0 %705 }
 0x6fb   : > { %vm707_vm7 = vcmp.eq.s32.totalorder %v1984_v14, 1 }
 0x75e   : > { %v691_v11 = vpop.permute.xlu1 %690 }
 0x75f   : > { %v693_v12 = vadd.f32 %v691_v11, %v683_v9 }
 0x761   : > { %1756 = vtanh.f32 %v693_v12  ;;  %v709_v34 = vsel %vm707_vm7, %v693_v12, %v587_v8  ;;  %v1572_v8 = vld [vmem:[%s1457_s14 + $0x28] sm:$0xff]  ;;  %s1203_s14 = smul.u32 4294967289, %s1812_s15 }
 0x763   : > { %s1204_s20 = sadd.s32 7, %s1203_s14 }
 0x76b   : > { %v1757_v13 = vpop.eup %1756 }
 0x76c   : > { %696 = vrot.lane.b32.xlu1 %v1757_v13, %s1829_s10  ;;  %v1065_v13 = vstv %s960_s22  ;;  %s2116_s22 = scalar_lea.vmem %s2188_s3, %s1591_s24 }
 0x76d   : > { %vm1066_vm12 = vcmp.gt.s32.totalorder %v1926_v16, %v1065_v13  ;;  %s1435_s24 = scalar_lea.vmem %s2116_s22, %s1550_s12  ;;  %s1831_s12 = smov 112  }
 0x7de   : > { %v697_v15 = vpop.permute.xlu1 %696 }
 0x7df   : > { %v1986_v17 = vmul.f32 %v1755_v5, %v697_v15 }
 0x7e1   : > { %v708_v18 = vsel %vm707_vm7, %v1986_v17, %v586_v54 }
 0x7e2   : > { %722 = vrot.lane.b32.xlu1 %v708_v18, %s1830_s11 }
 0x854   : > { %v723_v19 = vpop.permute.xlu1 %722 }
 0x855   : > { %1644 = vmatmul.mubr.msk.f32.vlgmr.msra.gmra.mrb[2].mxu1 %vm332_vm0, %v723_v19 }
 0x856   : > { %1691 = vmatpush3.bf16.msra.mxu1 %v1895_v4  ;;  %1657 = vmatprep.mubr.msk.f32.mxu1 %vm1823_vm1, %v1824_v1 }
 0x857   : > { %1695 = vmatprep.subr.bf16.mxu1 %v1822_v0 }
 0x928   : > { %v792_v21 = vpop.f32.mrb[2].mxu1 }
 0x929   : > { %v796_v22 = vadd.f32 %v1563_v20, %v792_v21  ;;  %v1645_v23 = vpop.f32.mrb[3].mxu1 }
 0x92b   : > { %1758 = vtanh.f32 %v796_v22  ;;  %v1565_v28 = vmul.f32 -1.442695, %v796_v22 }
 0x92d   : > { %1760 = vpow2.f32 %v1565_v28 }
 0x935   : > { %v1759_v25 = vpop.eup %1758 }
 0x936   : > { %806 = vrot.lane.b32.xlu0 %v1759_v25, %s1826_s30 }
 0x937   : > { %v1761_v0 = vpop.eup %1760 }
 0x938   : > { %v800_v29 = vadd.f32 1.0, %v1761_v0 }
 0x93a   : > { %826 = vperm.xlu0 %1733, %v824_v26   ;;  %1762 = vrcp.f32 %v800_v29 }
 0x944   : > { %v1763_v31 = vpop.eup %1762 }
 0x945   : > { %v804_v35 = vmul.f32 %v1763_v31, %v709_v34 }
 0x9a8   : > { %v807_v32 = vpop.permute.xlu0 %806 }
 0x9a9   : > { %v809_v33 = vmul.f32 %v1763_v31, %v807_v32 }
 0x9ab   : > { %811 = vrot.lane.b32.xlu1 %v809_v33, %s1827_s5 }
 0x9b9   : > { %v2010_v39 = vpop.permute.xlu0 %826 }
 0x9ba   : > { %vm828_vm9 = vcmp.eq.s32.totalorder %v2010_v39, 1 }
 0xa1d   : > { %v812_v36 = vpop.permute.xlu1 %811 }
 0xa1e   : > { %v814_v37 = vadd.f32 %v812_v36, %v804_v35 }
 0xa20   : > { %1764 = vtanh.f32 %v814_v37  ;;  %v830_v59 = vsel %vm828_vm9, %v814_v37, %v709_v34  ;;  %v1578_v34 = vld [vmem:[%s1465_s26 + $0x30] sm:$0xff]  ;;  %s471_s26 = scalar_lea.vmem %s2116_s22, %s1547_s25  ;;  %s1443_s25 = scalar_lea.vmem %s2116_s22, %s1556_s21 }
 0xa21   : > { %s1461_s21 = scalar_lea.vmem %s2116_s22, %s1571_s13 }
 0xa2a   : > { %v1765_v38 = vpop.eup %1764 }
 0xa2b   : > { %817 = vrot.lane.b32.xlu1 %v1765_v38, %s1829_s10  ;;  %v1187_v38 = vstv %s1082_s6 }
 0xa2c   : > { %vm1188_vm14 = vcmp.gt.s32.totalorder %v1926_v16, %v1187_v38 }
 0xa9d   : > { %v818_v40 = vpop.permute.xlu1 %817 }
 0xa9e   : > { %v2012_v41 = vmul.f32 %v1763_v31, %v818_v40 }
 0xaa0   : > { %v829_v42 = vsel %vm828_vm9, %v2012_v41, %v708_v18 }
 0xaa1   : > { %843 = vrot.lane.b32.xlu0 %v829_v42, %s1830_s11 }
 0xb13   : > { %v844_v43 = vpop.permute.xlu0 %843 }
 0xb14   : > { %1651 = vmatmul.mubr.msk.f32.vlgmr.msra.gmra.mrb[4].mxu0 %vm332_vm0, %v844_v43 }
 0xb15   : > { %1694 = vmatpush3.bf16.msra.mxu0 %v1895_v4  ;;  %1664 = vmatprep.mubr.msk.f32.mxu0 %vm1823_vm1, %v1824_v1 }
 0xbe7   : > { %v913_v45 = vpop.f32.mrb[4].mxu0 }
 0xbe8   : > { %v917_v46 = vadd.f32 %v913_v45, %v841_v44  ;;  %v1652_v47 = vpop.f32.mrb[5].mxu0 }
 0xbea   : > { %1766 = vtanh.f32 %v917_v46  ;;  %v1570_v52 = vmul.f32 -1.442695, %v917_v46 }
 0xbec   : > { %1768 = vpow2.f32 %v1570_v52 }
 0xbf4   : > { %v1767_v49 = vpop.eup %1766 }
 0xbf5   : > { %927 = vrot.lane.b32.xlu1 %v1767_v49, %s1826_s30 }
 0xbf6   : > { %v1769_v54 = vpop.eup %1768 }
 0xbf7   : > { %v921_v55 = vadd.f32 1.0, %v1769_v54 }
 0xbf9   : > { %947 = vperm.xlu1 %1732, %v945_v50   ;;  %1770 = vrcp.f32 %v921_v55 }
 0xc03   : > { %v1771_v56 = vpop.eup %1770 }
 0xc04   : > { %v925_v60 = vmul.f32 %v1771_v56, %v830_v59 }
 0xc67   : > { %v928_v57 = vpop.permute.xlu1 %927 }
 0xc68   : > { %v930_v58 = vmul.f32 %v1771_v56, %v928_v57 }
 0xc6a   : > { %932 = vrot.lane.b32.xlu0 %v930_v58, %s1827_s5 }
 0xc78   : > { %v2035_v2 = vpop.permute.xlu1 %947 }
 0xc79   : > { %vm949_vm11 = vcmp.eq.s32.totalorder %v2035_v2, 1 }
 0xcdc   : > { %v933_v61 = vpop.permute.xlu0 %932 }
 0xcdd   : > { %v935_v62 = vadd.f32 %v933_v61, %v925_v60  ;;  %v1584_v61 = vld [vmem:[%s1473_s9 + $0x38] sm:$0xff] }
 0xcdf   : > { %1772 = vtanh.f32 %v935_v62  ;;  %v951_v23 = vsel %vm949_vm11, %v935_v62, %v830_v59 }
 0xce9   : > { %v1773_v63 = vpop.eup %1772 }
 0xcea   : > { %938 = vrot.lane.b32.xlu0 %v1773_v63, %s1829_s10 }
 0xd5c   : > { %v939_v3 = vpop.permute.xlu0 %938 }
 0xd5d   : > { %v2037_v5 = vmul.f32 %v1771_v56, %v939_v3 }
 0xd5f   : > { %v950_v6 = vsel %vm949_vm11, %v2037_v5, %v829_v42  ;;  %v1189_v42 = vsel %vm1188_vm14, 1, %v1825_v10 }
 0xd60   : > { %965 = vrot.lane.b32.xlu1 %v950_v6, %s1830_s11 }
 0xdd2   : > { %v966_v7 = vpop.permute.xlu1 %965 }
 0xdd3   : > { %1658 = vmatmul.mubr.msk.f32.vlgmr.msra.gmra.mrb[4].mxu1 %vm332_vm0, %v966_v7 }
 0xdd4   : > { %1697 = vmatpush3.bf16.msra.mxu1 %v1895_v4  ;;  %1671 = vmatprep.mubr.msk.f32.mxu1 %vm1823_vm1, %v1824_v1  ;;  %v1067_v4 = vsel %vm1066_vm12, 1, %v1825_v10 }
 0xea6   : > { %v1035_v9 = vpop.f32.mrb[4].mxu1 }
 0xea7   : > { %v1039_v11 = vadd.f32 %v1572_v8, %v1035_v9  ;;  %v1659_v12 = vpop.f32.mrb[5].mxu1  ;;  %v466_v9 = vsel %vm460_vm3, %v1934_v30, 0.0 }
 0xea9   : > { %1774 = vtanh.f32 %v1039_v11  ;;  %v1574_v1 = vmul.f32 -1.442695, %v1039_v11  ;;  %v710_v11 = vsel %vm707_vm7, %v1986_v17, 0.0 }
 0xeab   : > { %1776 = vpow2.f32 %v1574_v1 }
 0xeb3   : > { %v1775_v15 = vpop.eup %1774 }
 0xeb4   : > { %1049 = vrot.lane.b32.xlu0 %v1775_v15, %s1826_s30 }
 0xeb5   : > { %v1777_v18 = vpop.eup %1776 }
 0xeb6   : > { %v1043_v19 = vadd.f32 1.0, %v1777_v18 }
 0xeb8   : > { %1069 = vperm.xlu0 %1733, %v1067_v4   ;;  %1778 = vrcp.f32 %v1043_v19 }
 0xec2   : > { %v1779_v20 = vpop.eup %1778 }
 0xec3   : > { %v1047_v24 = vmul.f32 %v1779_v20, %v951_v23 }
 0xf26   : > { %v1050_v21 = vpop.permute.xlu0 %1049 }
 0xf27   : > { %v1052_v22 = vmul.f32 %v1779_v20, %v1050_v21  ;;  %v588_v21 = vsel %vm585_vm5, %v1960_v53, 0.0 }
 0xf29   : > { %1054 = vrot.lane.b32.xlu1 %v1052_v22, %s1827_s5  ;;  %v831_v22 = vsel %vm828_vm9, %v2012_v41, 0.0 }
 0xf37   : > { %v2060_v0 = vpop.permute.xlu0 %1069 }
 0xf38   : > { %vm1071_vm13 = vcmp.eq.s32.totalorder %v2060_v0, 1 }
 0xf9b   : > { %v1055_v25 = vpop.permute.xlu1 %1054 }
 0xf9c   : > { %v1057_v26 = vadd.f32 %v1055_v25, %v1047_v24 }
 0xf9e   : > { %1780 = vtanh.f32 %v1057_v26  ;;  %v1073_v49 = vsel %vm1071_vm13, %v1057_v26, %v951_v23 }
 0xfa8   : > { %v1781_v28 = vpop.eup %1780 }
 0xfa9   : > { %1060 = vrot.lane.b32.xlu1 %v1781_v28, %s1829_s10 }
0x101b   : > { %v1061_v29 = vpop.permute.xlu1 %1060 }
0x101c   : > { %v2062_v31 = vmul.f32 %v1779_v20, %v1061_v29 }
0x101e   : > { %v1072_v32 = vsel %vm1071_vm13, %v2062_v31, %v950_v6  ;;  %v1309_v6 = vstv %s1204_s20  ;;  %v1074_v23 = vsel %vm1071_vm13, %v2062_v31, 0.0 }
0x101f   : > { %1087 = vrot.lane.b32.xlu0 %v1072_v32, %s1830_s11  ;;  %vm1310_vm1 = vcmp.gt.s32.totalorder %v1926_v16, %v1309_v6  ;;  %v952_v16 = vsel %vm949_vm11, %v2037_v5, 0.0 }
0x1020   : > { %v1311_v8 = vsel %vm1310_vm1, 1, %v1825_v10 }
0x1091   : > { %v1088_v33 = vpop.permute.xlu0 %1087 }
0x1092   : > { %1665 = vmatmul.mubr.msk.f32.vlgmr.msra.gmra.mrb[6].mxu0 %vm332_vm0, %v1088_v33 }
0x1165   : > { %v1157_v35 = vpop.f32.mrb[6].mxu0 }
0x1166   : > { %v1161_v36 = vadd.f32 %v1578_v34, %v1157_v35  ;;  %v1666_v37 = vpop.f32.mrb[7].mxu0 }
0x1168   : > { %1782 = vtanh.f32 %v1161_v36  ;;  %v1580_v43 = vmul.f32 -1.442695, %v1161_v36 }
0x116a   : > { %1784 = vpow2.f32 %v1580_v43 }
0x1172   : > { %v1783_v40 = vpop.eup %1782 }
0x1173   : > { %1171 = vrot.lane.b32.xlu1 %v1783_v40, %s1826_s30 }
0x1174   : > { %v1785_v44 = vpop.eup %1784 }
0x1175   : > { %v1165_v45 = vadd.f32 1.0, %v1785_v44 }
0x1177   : > { %1191 = vperm.xlu1 %1732, %v1189_v42   ;;  %1786 = vrcp.f32 %v1165_v45 }
0x1181   : > { %v1787_v46 = vpop.eup %1786 }
0x1182   : > { %v1169_v50 = vmul.f32 %v1787_v46, %v1073_v49 }
0x11e5   : > { %v1172_v47 = vpop.permute.xlu1 %1171 }
0x11e6   : > { %v1174_v48 = vmul.f32 %v1787_v46, %v1172_v47 }
0x11e8   : > { %1176 = vrot.lane.b32.xlu0 %v1174_v48, %s1827_s5 }
0x11f6   : > { %v1192_v56 = vpop.permute.xlu1 %1191 }
0x11f7   : > { %vm1193_vm15 = vcmp.eq.s32.totalorder %v1192_v56, 1 }
0x125a   : > { %v1177_v52 = vpop.permute.xlu0 %1176 }
0x125b   : > { %v1179_v54 = vadd.f32 %v1177_v52, %v1169_v50 }
0x125d   : > { %1788 = vtanh.f32 %v1179_v54  ;;  %v1195_v15 = vsel %vm1193_vm15, %v1179_v54, %v1073_v49 }
0x1267   : > { %v1789_v55 = vpop.eup %1788 }
0x1268   : > { %1182 = vrot.lane.b32.xlu0 %v1789_v55, %s1829_s10 }
0x12da   : > { %v1183_v57 = vpop.permute.xlu0 %1182 }
0x12db   : > { %v1185_v58 = vmul.f32 %v1787_v46, %v1183_v57 }
0x12dd   : > { %v2083_v59 = vsel %vm1193_vm15, %v1185_v58, %v1072_v32  ;;  %v1196_v10 = vsel %vm1193_vm15, %v1185_v58, 0.0 }
0x12de   : > { %1209 = vrot.lane.b32.xlu1 %v2083_v59, %s1830_s11 }
0x1350   : > { %v1210_v60 = vpop.permute.xlu1 %1209 }
0x1351   : > { %1672 = vmatmul.mubr.msk.f32.vlgmr.msra.gmra.mrb[6].mxu1 %vm332_vm0, %v1210_v60 }
0x1424   : > { %v1279_v62 = vpop.f32.mrb[6].mxu1 }
0x1425   : > { %v1283_v63 = vadd.f32 %v1584_v61, %v1279_v62  ;;  %v1673_v3 = vpop.f32.mrb[7].mxu1 }
0x1427   : > { %1790 = vtanh.f32 %v1283_v63  ;;  %v1586_v27 = vmul.f32 -1.442695, %v1283_v63 }
0x1429   : > { %1792 = vpow2.f32 %v1586_v27 }
0x1431   : > { %v1791_v7 = vpop.eup %1790 }
0x1432   : > { %1293 = vrot.lane.b32.xlu0 %v1791_v7, %s1826_s30 }
0x1433   : > { %v1793_v30 = vpop.eup %1792 }
0x1434   : > { %v1287_v12 = vadd.f32 1.0, %v1793_v30 }
0x1436   : > { %1313 = vperm.xlu0 %1733, %v1311_v8   ;;  %1794 = vrcp.f32 %v1287_v12 }
0x143a   : > { %468 = vrot.lane.b32.xlu0 %v466_v9, %s1830_s11 }
0x143e   : > { %712 = vrot.lane.b32.xlu0 %v710_v11, %s1830_s11 }
0x1440   : > { %v1795_v14 = vpop.eup %1794 }
0x1441   : > { %v1291_v4 = vmul.f32 %v1795_v14, %v1195_v15 }
0x1442   : > { %954 = vrot.lane.b32.xlu0 %v952_v16, %s1830_s11 }
0x1446   : > { %1198 = vrot.lane.b32.xlu0 %v1196_v10, %s1830_s11 }
0x14a4   : > { %v1294_v17 = vpop.permute.xlu0 %1293 }
0x14a5   : > { %v1296_v13 = vmul.f32 %v1795_v14, %v1294_v17 }
0x14a7   : > { %1298 = vrot.lane.b32.xlu1 %v1296_v13, %s1827_s5  ;;  %s1449_s5 = scalar_lea.vmem %s2116_s22, %s1562_s27  ;;  %s1546_s27 = sshll.u32 %s1886_s19, 3 }
0x14a8   : > { %s327_s9 = scalar_lea.vmem %s2189_s4, %s1546_s27 }
0x14b5   : > { %v1314_v2 = vpop.permute.xlu0 %1313 }
0x14b6   : > { %vm1315_vm2 = vcmp.eq.s32.totalorder %v1314_v2, 1 }
0x14b9   : > { %v469_v5 = vpop.permute.xlu0 %468 }
0x14ba   : > { %472 = vst.msk [vmem:[%s471_s26] sm:$0xff] %vm332_vm0, %v469_v5 }
0x14bd   : > { %v713_v53 = vpop.permute.xlu0 %712 }
0x14c1   : > { %v955_v26 = vpop.permute.xlu0 %954 }
0x14c5   : > { %v1199_v29 = vpop.permute.xlu0 %1198 }
0x1519   : > { %v1299_v1 = vpop.permute.xlu1 %1298 }
0x151a   : > { %v1301_v18 = vadd.f32 %v1299_v1, %v1291_v4 }
0x151c   : > { %1796 = vtanh.f32 %v1301_v18  ;;  %v1317_v19 = vsel %vm1315_vm2, %v1301_v18, %v1195_v15 }
0x1526   : > { %v1797_v20 = vpop.eup %1796 }
0x1527   : > { %1304 = vrot.lane.b32.xlu1 %v1797_v20, %s1829_s10  ;;  %s957_s10 = scalar_lea.vmem %s2116_s22, %s2024_s8  ;;  %s1477_s8 = scalar_lea.vmem %s2116_s22, %s1583_s7 }
0x152b   : > { %590 = vrot.lane.b32.xlu1 %v588_v21, %s1830_s11 }
0x152f   : > { %833 = vrot.lane.b32.xlu1 %v831_v22, %s1830_s11 }
0x1533   : > { %1076 = vrot.lane.b32.xlu1 %v1074_v23, %s1830_s11 }
0x1599   : > { %v1305_v51 = vpop.permute.xlu1 %1304 }
0x159a   : > { %v1307_v24 = vmul.f32 %v1795_v14, %v1305_v51 }
0x159c   : > { %v1318_v39 = vsel %vm1315_vm2, %v1307_v24, 0.0  ;;  %v1316_v41 = vsel %vm1315_vm2, %v1307_v24, %v2083_v59 }
0x159d   : > { %1320 = vrot.lane.b32.xlu1 %v1318_v39, %s1830_s11  ;;  %1326 = vrot.lane.b32.xlu0 %v1316_v41, %s1830_s11  ;;  %v591_v25 = vpop.permute.xlu1 %590  ;;  %s1469_s11 = scalar_lea.vmem %s2116_s22, %s1577_s23 }
0x159e   : > { %1555 = vst.msk [vmem:[%s1435_s24 + $0x8] sm:$0xff] %vm332_vm0, %v591_v25 }
0x159f   : > { %1561 = vst.msk [vmem:[%s1443_s25 + $0x10] sm:$0xff] %vm332_vm0, %v713_v53 }
0x15a1   : > { %1331 = vrot.lane.b32.xlu1 %v1317_v19, %s1831_s12  ;;  %v834_v28 = vpop.permute.xlu1 %833 }
0x15a2   : > { %1567 = vst.msk [vmem:[%s1449_s5 + $0x18] sm:$0xff] %vm332_vm0, %v834_v28 }
0x15a3   : > { %958 = vst.msk [vmem:[%s957_s10] sm:$0xff] %vm332_vm0, %v955_v26 }
0x15a5   : > { %v1077_v0 = vpop.permute.xlu1 %1076 }
0x15a6   : > { %1576 = vst.msk [vmem:[%s1461_s21 + $0x28] sm:$0xff] %vm332_vm0, %v1077_v0 }
0x15a7   : > { %1582 = vst.msk [vmem:[%s1469_s11 + $0x30] sm:$0xff] %vm332_vm0, %v1199_v29 }
0x160f   : > { %v1327_v31 = vpop.permute.xlu0 %1326  ;;  %v1321_v32 = vpop.permute.xlu1 %1320 }
0x1610   : > { %1329 = vst.msk [vmem:[#allocation2] sm:$0xff] %vm332_vm0, %v1327_v31  ;;  %1335 = vst.msk [vmem:[%s327_s9] sm:$0xff] %vm332_vm0, %v1327_v31 }
0x1611   : > { %1588 = vst.msk [vmem:[%s1477_s8 + $0x38] sm:$0xff] %vm332_vm0, %v1321_v32 }
0x1613   : > { %v1332_v33 = vpop.permute.xlu1 %1331 }
0x1614   : > { %1334 = vst.msk [vmem:[#allocation3] sm:$0xff] %vm332_vm0, %v1332_v33 }
0x1615 PF: > { %s15_s17 = sadd.s32 1, %s1820_s17   ;;  %s2190_s15 = smov %s1816_s16 }
0x1616   : > { %p12_p5 = scmp.ge.s32.totalorder %s15_s17, 4   ;;  %s2191_s16 = smov %s2193_s18 }
0x1618   :  { %14 = sbr.rel (!%p12_p5) target bundleno = 2 (0x2), region = 97 }

</bundles_post_ra>
